<compile_context>
chip_gen: v6e
topology: v6e:2x2x1
jax: 0.10.0
libtpu: 0.0.40
codegen_flags: <defaults>
</compile_context>

<pallas_src>
import functools

import jax
import jax.numpy as jnp
from jax.experimental import pallas as pl
from jax.experimental.pallas import tpu as pltpu


# ---------------------------------------------------------------------------
# Pallas kernels
# ---------------------------------------------------------------------------

def _mm(a, w):
    """bf16 MXU operands, f32 accumulation."""
    return jnp.dot(a.astype(jnp.bfloat16), w.astype(jnp.bfloat16),
                   preferred_element_type=jnp.float32)


def _layer_norm(y, g, b, eps):
    mu = jnp.mean(y, axis=-1, keepdims=True)
    var = jnp.mean((y - mu) ** 2, axis=-1, keepdims=True)
    return (y - mu) * jax.lax.rsqrt(var + eps) * g + b


def _matmul_bias_kernel(x_ref, w_ref, b_ref, o_ref):
    acc = _mm(x_ref[...], w_ref[...]) + b_ref[...]
    o_ref[...] = acc.astype(o_ref.dtype)


def matmul_bias(x, w, b):
    """(M,K) @ (K,N) + b — used for the patch projection (Conv2d-as-matmul)."""
    M, K = x.shape
    _, N = w.shape
    return pl.pallas_call(
        _matmul_bias_kernel,
        out_shape=jax.ShapeDtypeStruct((M, N), x.dtype),
        grid=(1,),
        in_specs=[
            pl.BlockSpec((M, K), lambda i: (0, 0)),
            pl.BlockSpec((K, N), lambda i: (0, 0)),
            pl.BlockSpec((1, N), lambda i: (0, 0)),
        ],
        out_specs=pl.BlockSpec((M, N), lambda i: (0, 0)),
    )(x, w, b.reshape(1, N))


def _encoder_layer_kernel(x_ref, in_w_ref, in_b_ref, out_w_ref, out_b_ref,
                          ln1_g_ref, ln1_b_ref, ff1_w_ref, ff1_b_ref,
                          ff2_w_ref, ff2_b_ref, ln2_g_ref, ln2_b_ref,
                          o_ref, *, num_heads, eps):
    """One fully fused post-norm TransformerEncoderLayer for one batch row."""
    x = x_ref[0]                                   # (S, E) f32
    S, E = x.shape
    DH = E // num_heads
    scale = 1.0 / float(DH) ** 0.5

    # --- QKV projection (one matmul, heads sliced from the VMEM result) ---
    qkv = _mm(x, in_w_ref[...]) + in_b_ref[...]    # (S, 3E)
    q = qkv[:, :E] * scale                         # fold attention scale into q
    k = qkv[:, E:2 * E]
    v = qkv[:, 2 * E:]

    # --- Multi-head attention; fold head outputs into the output projection ---
    out_w = out_w_ref[...]                         # (E, E)
    attn = jnp.zeros((S, E), jnp.float32)
    for h in range(num_heads):                     # unrolled (num_heads small)
        sl = slice(h * DH, (h + 1) * DH)
        qh = q[:, sl]                              # (S, DH)
        kh = k[:, sl]
        vh = v[:, sl]
        s = jnp.dot(qh.astype(jnp.bfloat16), kh.T.astype(jnp.bfloat16),
                    preferred_element_type=jnp.float32)              # (S, S)
        m = jnp.max(s, axis=-1, keepdims=True)
        p = jnp.exp(s - m)
        p = p * pl.reciprocal(jnp.sum(p, axis=-1, keepdims=True), approx=True)
        oh = jnp.dot(p.astype(jnp.bfloat16), vh.astype(jnp.bfloat16),
                     preferred_element_type=jnp.float32)             # (S, DH)
        # concat(o_h) @ W_out == sum_h o_h @ W_out[h*DH:(h+1)*DH, :]
        attn = attn + _mm(oh, out_w[sl, :])
    attn = attn + out_b_ref[...]

    # --- Residual + LayerNorm 1 ---
    h1 = _layer_norm(x + attn, ln1_g_ref[...], ln1_b_ref[...], eps)  # (S, E)

    # --- FFN (ReLU) ---
    ff = jnp.maximum(_mm(h1, ff1_w_ref[...]) + ff1_b_ref[...], 0.0)  # (S, F)
    ff = _mm(ff, ff2_w_ref[...]) + ff2_b_ref[...]                    # (S, E)

    # --- Residual + LayerNorm 2 ---
    o_ref[0] = _layer_norm(h1 + ff, ln2_g_ref[...], ln2_b_ref[...],
                           eps).astype(o_ref.dtype)


def encoder_layer(x, lp, num_heads):
    """Post-norm TransformerEncoderLayer fused into a single pallas_call."""
    B, S, E = x.shape
    F = lp["ff1_w"].shape[1]

    def const2(shape):
        return pl.BlockSpec(shape, lambda b: (0, 0))

    seq_spec = pl.BlockSpec((1, S, E), lambda b: (b, 0, 0))

    return pl.pallas_call(
        functools.partial(_encoder_layer_kernel, num_heads=num_heads, eps=1e-5),
        out_shape=jax.ShapeDtypeStruct((B, S, E), x.dtype),
        grid=(B,),
        in_specs=[
            seq_spec,                      # x
            const2((E, 3 * E)),            # in_proj_w
            const2((1, 3 * E)),            # in_proj_b
            const2((E, E)),                # out_proj_w
            const2((1, E)),                # out_proj_b
            const2((1, E)),                # ln1_g
            const2((1, E)),                # ln1_b
            const2((E, F)),                # ff1_w
            const2((1, F)),                # ff1_b
            const2((F, E)),                # ff2_w
            const2((1, E)),                # ff2_b
            const2((1, E)),                # ln2_g
            const2((1, E)),                # ln2_b
        ],
        out_specs=seq_spec,
        compiler_params=pltpu.CompilerParams(
            dimension_semantics=("parallel",)),
    )(x,
      lp["in_proj_w"], lp["in_proj_b"].reshape(1, 3 * E),
      lp["out_proj_w"], lp["out_proj_b"].reshape(1, E),
      lp["ln1_g"].reshape(1, E), lp["ln1_b"].reshape(1, E),
      lp["ff1_w"], lp["ff1_b"].reshape(1, F),
      lp["ff2_w"], lp["ff2_b"].reshape(1, E),
      lp["ln2_g"].reshape(1, E), lp["ln2_b"].reshape(1, E))


def _final_norm_kernel(x_ref, g1_ref, b1_ref, g2_ref, b2_ref, o_ref, *, eps):
    y = _layer_norm(x_ref[...], g1_ref[...], b1_ref[...], eps)
    o_ref[...] = _layer_norm(y, g2_ref[...], b2_ref[...], eps).astype(o_ref.dtype)


def final_norms(cls_tok, g1, b1, g2, b2, eps=1e-5):
    """Fused encoder-final LayerNorm + head LayerNorm applied to the cls row."""
    B, E = cls_tok.shape
    row = pl.BlockSpec((1, E), lambda i: (0, 0))
    return pl.pallas_call(
        functools.partial(_final_norm_kernel, eps=eps),
        out_shape=jax.ShapeDtypeStruct((B, E), cls_tok.dtype),
        grid=(1,),
        in_specs=[pl.BlockSpec((B, E), lambda i: (0, 0)), row, row, row, row],
        out_specs=pl.BlockSpec((B, E), lambda i: (0, 0)),
    )(cls_tok, g1.reshape(1, E), b1.reshape(1, E),
      g2.reshape(1, E), b2.reshape(1, E))


# ---------------------------------------------------------------------------
# Model glue (plain JAX: reshapes / transposes / parameter bookkeeping)
# ---------------------------------------------------------------------------

@functools.partial(jax.jit, static_argnums=(2, 3, 4))
def vit_forward(x, params, patch_size, embed_dim, num_heads):
    B, C, H, W = x.shape
    p = patch_size
    Hp, Wp = H // p, W // p
    N = Hp * Wp
    E = embed_dim

    # Conv2d(kernel=stride=patch) == per-patch matmul: extract patches (glue),
    # project inside the Pallas matmul kernel.
    xp = (x.reshape(B, C, Hp, p, Wp, p)
            .transpose(0, 2, 4, 1, 3, 5)
            .reshape(B * N, C * p * p))
    tok = matmul_bias(xp, params["patch_w"], params["patch_b"]).reshape(B, N, E)

    cls = jnp.broadcast_to(params["cls_token"], (B, 1, E))
    h = jnp.concatenate([cls, tok], axis=1) + params["pos_embed"]   # (B, S, E)
    # dropout(0.1) -> identity in eval mode.

    for lp in params["layers"]:
        h = encoder_layer(h, lp, num_heads)

    # LayerNorm is per-row, so applying the final encoder norm + head norm to
    # the cls row only is exactly equivalent to normalizing the full sequence
    # and then selecting row 0 (and avoids the old zero-residual kernels).
    cls_out = final_norms(h[:, 0], params["enc_norm_g"], params["enc_norm_b"],
                          params["norm_g"], params["norm_b"])        # (B, E)
    return cls_out[:, 0]                                             # (B,)


def init_params(key, in_channels, patch_size, embed_dim, num_layers,
                num_heads, mlp_ratio, num_patches):
    E = embed_dim
    F = embed_dim * mlp_ratio

    def dense(k, fan_in, fan_out):
        kw, kb = jax.random.split(k)
        lim = 1.0 / float(fan_in) ** 0.5
        w = jax.random.uniform(kw, (fan_in, fan_out), jnp.float32, -lim, lim)
        b = jax.random.uniform(kb, (fan_out,), jnp.float32, -lim, lim)
        return w, b

    keys = jax.random.split(key, 1 + num_layers)
    patch_w, patch_b = dense(keys[0], in_channels * patch_size * patch_size, E)

    params = {
        "patch_w": patch_w, "patch_b": patch_b,
        "cls_token": jnp.zeros((1, 1, E), jnp.float32),
        "pos_embed": jnp.zeros((1, num_patches + 1, E), jnp.float32),
        "enc_norm_g": jnp.ones((E,), jnp.float32),
        "enc_norm_b": jnp.zeros((E,), jnp.float32),
        "norm_g": jnp.ones((E,), jnp.float32),
        "norm_b": jnp.zeros((E,), jnp.float32),
        "layers": [],
    }
    for l in range(num_layers):
        lk = jax.random.split(keys[1 + l], 4)
        in_w, in_b = dense(lk[0], E, 3 * E)
        out_w, out_b = dense(lk[1], E, E)
        ff1_w, ff1_b = dense(lk[2], E, F)
        ff2_w, ff2_b = dense(lk[3], F, E)
        params["layers"].append(dict(
            in_proj_w=in_w, in_proj_b=in_b,
            out_proj_w=out_w, out_proj_b=out_b,
            ff1_w=ff1_w, ff1_b=ff1_b,
            ff2_w=ff2_w, ff2_b=ff2_b,
            ln1_g=jnp.ones((E,), jnp.float32), ln1_b=jnp.zeros((E,), jnp.float32),
            ln2_g=jnp.ones((E,), jnp.float32), ln2_b=jnp.zeros((E,), jnp.float32),
        ))
    return params


if __name__ == "__main__":
    B, C, H, W = 2, 4, 16, 16
    PATCH, EMBED, LAYERS, HEADS, MLP = 4, 32, 2, 4, 2

    key = jax.random.PRNGKey(0)
    kx, kp = jax.random.split(key)
    x = jax.random.normal(kx, (B, C, H, W), jnp.float32)

    num_patches = (H // PATCH) * (W // PATCH)
    params = init_params(kp, C, PATCH, EMBED, LAYERS, HEADS, MLP, num_patches)

    out = vit_forward(x, params, PATCH, EMBED, HEADS)
    out = jax.block_until_ready(out)
    assert out.shape == (B,), out.shape
    assert jnp.all(jnp.isfinite(out))
    print("KERNEL_OK")
</pallas_src>

<mosaic_0001>
module attributes {stable_mosaic.version = 11 : i64} {
  func.func @_matmul_bias_kernel(%arg0: i32, %arg1: memref<32x64xf32, #tpu.memory_space<vmem>>, %arg2: memref<64x32xf32, #tpu.memory_space<vmem>>, %arg3: memref<1x32xf32, #tpu.memory_space<vmem>>, %arg4: memref<32x32xf32, #tpu.memory_space<vmem>>) attributes {dimension_semantics = [#tpu.dimension_semantics<arbitrary>], iteration_bounds = array<i64: 1>, scalar_prefetch = 0 : i64, scratch_operands = 0 : i64, tpu.core_type = #tpu.core_type<tc>, window_params = [{pipeline_mode = #tpu.pipeline_mode<synchronous>, transform_indices = @transform_0, window_bounds = array<i64: 32, 64>}, {pipeline_mode = #tpu.pipeline_mode<synchronous>, transform_indices = @transform_1, window_bounds = array<i64: 64, 32>}, {pipeline_mode = #tpu.pipeline_mode<synchronous>, transform_indices = @transform_2, window_bounds = array<i64: 1, 32>}, {pipeline_mode = #tpu.pipeline_mode<synchronous>, transform_indices = @transform_3, window_bounds = array<i64: 32, 32>}]} {
    %c0 = arith.constant 0 : index
    %c0_0 = arith.constant 0 : index
    %0 = vector.load %arg1[%c0, %c0_0] : memref<32x64xf32, #tpu.memory_space<vmem>>, vector<32x64xf32>
    %c0_1 = arith.constant 0 : index
    %c0_2 = arith.constant 0 : index
    %1 = vector.load %arg2[%c0_1, %c0_2] : memref<64x32xf32, #tpu.memory_space<vmem>>, vector<64x32xf32>
    %2 = arith.truncf %0 : vector<32x64xf32> to vector<32x64xbf16>
    %3 = arith.truncf %1 : vector<64x32xf32> to vector<64x32xbf16>
    %cst = arith.constant dense<0.000000e+00> : vector<32x32xf32>
    %4 = tpu.matmul %2, %3, %cst {dimension_numbers = #tpu.dot_dimension_numbers<[1], [0], [0], [1], [0, 0, 1, 1], [], []>} : vector<32x64xbf16>, vector<64x32xbf16>, vector<32x32xf32> -> vector<32x32xf32>
    %c0_3 = arith.constant 0 : index
    %c0_4 = arith.constant 0 : index
    %5 = vector.load %arg3[%c0_3, %c0_4] : memref<1x32xf32, #tpu.memory_space<vmem>>, vector<1x32xf32>
    %6 = vector.broadcast %5 : vector<1x32xf32> to vector<32x32xf32>
    %7 = arith.addf %4, %6 : vector<32x32xf32>
    %c0_5 = arith.constant 0 : index
    %c0_6 = arith.constant 0 : index
    %8 = vector.load %arg4[%c0_5, %c0_6] : memref<32x32xf32, #tpu.memory_space<vmem>>, vector<32x32xf32>
    tpu.vector_store %arg4[%c0_5, %c0_6], %7 {strides = array<i32>} : memref<32x32xf32, #tpu.memory_space<vmem>>, vector<32x32xf32>,
    return
  }
  func.func @transform_0(%arg0: i32) -> (i32, i32) {
    %c0_i32 = arith.constant 0 : i32
    %c0_i32_0 = arith.constant 0 : i32
    %c0_i32_1 = arith.constant 0 : i32
    return %c0_i32, %c0_i32_0 : i32, i32
  }
  func.func @transform_1(%arg0: i32) -> (i32, i32) {
    %c0_i32 = arith.constant 0 : i32
    %c0_i32_0 = arith.constant 0 : i32
    %c0_i32_1 = arith.constant 0 : i32
    return %c0_i32, %c0_i32_0 : i32, i32
  }
  func.func @transform_2(%arg0: i32) -> (i32, i32) {
    %c0_i32 = arith.constant 0 : i32
    %c0_i32_0 = arith.constant 0 : i32
    %c0_i32_1 = arith.constant 0 : i32
    return %c0_i32, %c0_i32_0 : i32, i32
  }
  func.func @transform_3(%arg0: i32) -> (i32, i32) {
    %c0_i32 = arith.constant 0 : i32
    %c0_i32_0 = arith.constant 0 : i32
    %c0_i32_1 = arith.constant 0 : i32
    return %c0_i32, %c0_i32_0 : i32, i32
  }
}

module attributes {stable_mosaic.version = 11 : i64} {
  func.func @_encoder_layer_kernel(%arg0: i32, %arg1: memref<1x17x32xf32, #tpu.memory_space<vmem>>, %arg2: memref<32x96xf32, #tpu.memory_space<vmem>>, %arg3: memref<1x96xf32, #tpu.memory_space<vmem>>, %arg4: memref<32x32xf32, #tpu.memory_space<vmem>>, %arg5: memref<1x32xf32, #tpu.memory_space<vmem>>, %arg6: memref<1x32xf32, #tpu.memory_space<vmem>>, %arg7: memref<1x32xf32, #tpu.memory_space<vmem>>, %arg8: memref<32x64xf32, #tpu.memory_space<vmem>>, %arg9: memref<1x64xf32, #tpu.memory_space<vmem>>, %arg10: memref<64x32xf32, #tpu.memory_space<vmem>>, %arg11: memref<1x32xf32, #tpu.memory_space<vmem>>, %arg12: memref<1x32xf32, #tpu.memory_space<vmem>>, %arg13: memref<1x32xf32, #tpu.memory_space<vmem>>, %arg14: memref<1x17x32xf32, #tpu.memory_space<vmem>>) attributes {dimension_semantics = [#tpu.dimension_semantics<parallel>], iteration_bounds = array<i64: 2>, scalar_prefetch = 0 : i64, scratch_operands = 0 : i64, tpu.core_type = #tpu.core_type<tc>, window_params = [{transform_indices = @transform_0, window_bounds = array<i64: 1, 17, 32>}, {pipeline_mode = #tpu.pipeline_mode<synchronous>, transform_indices = @transform_1, window_bounds = array<i64: 32, 96>}, {pipeline_mode = #tpu.pipeline_mode<synchronous>, transform_indices = @transform_2, window_bounds = array<i64: 1, 96>}, {pipeline_mode = #tpu.pipeline_mode<synchronous>, transform_indices = @transform_3, window_bounds = array<i64: 32, 32>}, {pipeline_mode = #tpu.pipeline_mode<synchronous>, transform_indices = @transform_4, window_bounds = array<i64: 1, 32>}, {pipeline_mode = #tpu.pipeline_mode<synchronous>, transform_indices = @transform_5, window_bounds = array<i64: 1, 32>}, {pipeline_mode = #tpu.pipeline_mode<synchronous>, transform_indices = @transform_6, window_bounds = array<i64: 1, 32>}, {pipeline_mode = #tpu.pipeline_mode<synchronous>, transform_indices = @transform_7, window_bounds = array<i64: 32, 64>}, {pipeline_mode = #tpu.pipeline_mode<synchronous>, transform_indices = @transform_8, window_bounds = array<i64: 1, 64>}, {pipeline_mode = #tpu.pipeline_mode<synchronous>, transform_indices = @transform_9, window_bounds = array<i64: 64, 32>}, {pipeline_mode = #tpu.pipeline_mode<synchronous>, transform_indices = @transform_10, window_bounds = array<i64: 1, 32>}, {pipeline_mode = #tpu.pipeline_mode<synchronous>, transform_indices = @transform_11, window_bounds = array<i64: 1, 32>}, {pipeline_mode = #tpu.pipeline_mode<synchronous>, transform_indices = @transform_12, window_bounds = array<i64: 1, 32>}, {transform_indices = @transform_13, window_bounds = array<i64: 1, 17, 32>}]} {
    %c0 = arith.constant 0 : index
    %c0_0 = arith.constant 0 : index
    %c0_1 = arith.constant 0 : index
    %0 = vector.load %arg1[%c0, %c0_0, %c0_1] : memref<1x17x32xf32, #tpu.memory_space<vmem>>, vector<1x17x32xf32>
    %1 = vector.shape_cast %0 : vector<1x17x32xf32> to vector<17x32xf32>
    %c0_2 = arith.constant 0 : index
    %c0_3 = arith.constant 0 : index
    %2 = vector.load %arg2[%c0_2, %c0_3] : memref<32x96xf32, #tpu.memory_space<vmem>>, vector<32x96xf32>
    %3 = arith.truncf %1 : vector<17x32xf32> to vector<17x32xbf16>
    %4 = arith.truncf %2 : vector<32x96xf32> to vector<32x96xbf16>
    %cst = arith.constant dense<0.000000e+00> : vector<17x96xf32>
    %5 = tpu.matmul %3, %4, %cst {dimension_numbers = #tpu.dot_dimension_numbers<[1], [0], [0], [1], [0, 0, 1, 1], [], []>} : vector<17x32xbf16>, vector<32x96xbf16>, vector<17x96xf32> -> vector<17x96xf32>
    %c0_4 = arith.constant 0 : index
    %c0_5 = arith.constant 0 : index
    %6 = vector.load %arg3[%c0_4, %c0_5] : memref<1x96xf32, #tpu.memory_space<vmem>>, vector<1x96xf32>
    %7 = vector.broadcast %6 : vector<1x96xf32> to vector<17x96xf32>
    %8 = arith.addf %5, %7 : vector<17x96xf32>
    %9 = vector.extract_strided_slice %8 {offsets = [0, 0], sizes = [17, 32], strides = [1, 1]} : vector<17x96xf32> to vector<17x32xf32>
    %cst_6 = arith.constant 0.353553385 : f32
    %10 = vector.broadcast %cst_6 : f32 to vector<17x32xf32>
    %11 = arith.mulf %9, %10 : vector<17x32xf32>
    %12 = vector.extract_strided_slice %8 {offsets = [0, 32], sizes = [17, 32], strides = [1, 1]} : vector<17x96xf32> to vector<17x32xf32>
    %13 = vector.extract_strided_slice %8 {offsets = [0, 64], sizes = [17, 32], strides = [1, 1]} : vector<17x96xf32> to vector<17x32xf32>
    %c0_7 = arith.constant 0 : index
    %c0_8 = arith.constant 0 : index
    %14 = vector.load %arg4[%c0_7, %c0_8] : memref<32x32xf32, #tpu.memory_space<vmem>>, vector<32x32xf32>
    %cst_9 = arith.constant 0.000000e+00 : f32
    %15 = vector.broadcast %cst_9 : f32 to vector<17x32xf32>
    %16 = vector.extract_strided_slice %11 {offsets = [0, 0], sizes = [17, 8], strides = [1, 1]} : vector<17x32xf32> to vector<17x8xf32>
    %17 = vector.extract_strided_slice %12 {offsets = [0, 0], sizes = [17, 8], strides = [1, 1]} : vector<17x32xf32> to vector<17x8xf32>
    %18 = vector.extract_strided_slice %13 {offsets = [0, 0], sizes = [17, 8], strides = [1, 1]} : vector<17x32xf32> to vector<17x8xf32>
    %19 = arith.truncf %16 : vector<17x8xf32> to vector<17x8xbf16>
    %20 = tpu.transpose %17, [1, 0] : vector<17x8xf32> -> vector<8x17xf32>
    %21 = arith.truncf %20 : vector<8x17xf32> to vector<8x17xbf16>
    %cst_10 = arith.constant dense<0.000000e+00> : vector<17x17xf32>
    %22 = tpu.matmul %19, %21, %cst_10 {dimension_numbers = #tpu.dot_dimension_numbers<[1], [0], [0], [1], [0, 0, 1, 1], [], []>} : vector<17x8xbf16>, vector<8x17xbf16>, vector<17x17xf32> -> vector<17x17xf32>
    %cst_11 = arith.constant dense<0xFF800000> : vector<17xf32>
    %23 = vector.multi_reduction <maximumf>, %22, %cst_11 [1] : vector<17x17xf32> to vector<17xf32>
    %24 = vector.shape_cast %23 : vector<17xf32> to vector<17x1xf32>
    %25 = vector.broadcast %24 : vector<17x1xf32> to vector<17x17xf32>
    %26 = arith.subf %22, %25 : vector<17x17xf32>
    %27 = math.exp %26 : vector<17x17xf32>
    %cst_12 = arith.constant dense<0.000000e+00> : vector<17xf32>
    %28 = vector.multi_reduction <add>, %27, %cst_12 [1] : vector<17x17xf32> to vector<17xf32>
    %29 = vector.shape_cast %28 : vector<17xf32> to vector<17x1xf32>
    %30 = tpu.reciprocal %29 {approx = true} : vector<17x1xf32> -> vector<17x1xf32>
    %31 = vector.broadcast %30 : vector<17x1xf32> to vector<17x17xf32>
    %32 = arith.mulf %27, %31 : vector<17x17xf32>
    %33 = arith.truncf %32 : vector<17x17xf32> to vector<17x17xbf16>
    %34 = arith.truncf %18 : vector<17x8xf32> to vector<17x8xbf16>
    %cst_13 = arith.constant dense<0.000000e+00> : vector<17x8xf32>
    %35 = tpu.matmul %33, %34, %cst_13 {dimension_numbers = #tpu.dot_dimension_numbers<[1], [0], [0], [1], [0, 0, 1, 1], [], []>} : vector<17x17xbf16>, vector<17x8xbf16>, vector<17x8xf32> -> vector<17x8xf32>
    %36 = vector.extract_strided_slice %14 {offsets = [0, 0], sizes = [8, 32], strides = [1, 1]} : vector<32x32xf32> to vector<8x32xf32>
    %37 = arith.truncf %35 : vector<17x8xf32> to vector<17x8xbf16>
    %38 = arith.truncf %36 : vector<8x32xf32> to vector<8x32xbf16>
    %cst_14 = arith.constant dense<0.000000e+00> : vector<17x32xf32>
    %39 = tpu.matmul %37, %38, %cst_14 {dimension_numbers = #tpu.dot_dimension_numbers<[1], [0], [0], [1], [0, 0, 1, 1], [], []>} : vector<17x8xbf16>, vector<8x32xbf16>, vector<17x32xf32> -> vector<17x32xf32>
    %40 = arith.addf %15, %39 : vector<17x32xf32>
    %41 = vector.extract_strided_slice %11 {offsets = [0, 8], sizes = [17, 8], strides = [1, 1]} : vector<17x32xf32> to vector<17x8xf32>
    %42 = vector.extract_strided_slice %12 {offsets = [0, 8], sizes = [17, 8], strides = [1, 1]} : vector<17x32xf32> to vector<17x8xf32>
    %43 = vector.extract_strided_slice %13 {offsets = [0, 8], sizes = [17, 8], strides = [1, 1]} : vector<17x32xf32> to vector<17x8xf32>
    %44 = arith.truncf %41 : vector<17x8xf32> to vector<17x8xbf16>
    %45 = tpu.transpose %42, [1, 0] : vector<17x8xf32> -> vector<8x17xf32>
    %46 = arith.truncf %45 : vector<8x17xf32> to vector<8x17xbf16>
    %cst_15 = arith.constant dense<0.000000e+00> : vector<17x17xf32>
    %47 = tpu.matmul %44, %46, %cst_15 {dimension_numbers = #tpu.dot_dimension_numbers<[1], [0], [0], [1], [0, 0, 1, 1], [], []>} : vector<17x8xbf16>, vector<8x17xbf16>, vector<17x17xf32> -> vector<17x17xf32>
    %cst_16 = arith.constant dense<0xFF800000> : vector<17xf32>
    %48 = vector.multi_reduction <maximumf>, %47, %cst_16 [1] : vector<17x17xf32> to vector<17xf32>
    %49 = vector.shape_cast %48 : vector<17xf32> to vector<17x1xf32>
    %50 = vector.broadcast %49 : vector<17x1xf32> to vector<17x17xf32>
    %51 = arith.subf %47, %50 : vector<17x17xf32>
    %52 = math.exp %51 : vector<17x17xf32>
    %cst_17 = arith.constant dense<0.000000e+00> : vector<17xf32>
    %53 = vector.multi_reduction <add>, %52, %cst_17 [1] : vector<17x17xf32> to vector<17xf32>
    %54 = vector.shape_cast %53 : vector<17xf32> to vector<17x1xf32>
    %55 = tpu.reciprocal %54 {approx = true} : vector<17x1xf32> -> vector<17x1xf32>
    %56 = vector.broadcast %55 : vector<17x1xf32> to vector<17x17xf32>
    %57 = arith.mulf %52, %56 : vector<17x17xf32>
    %58 = arith.truncf %57 : vector<17x17xf32> to vector<17x17xbf16>
    %59 = arith.truncf %43 : vector<17x8xf32> to vector<17x8xbf16>
    %cst_18 = arith.constant dense<0.000000e+00> : vector<17x8xf32>
    %60 = tpu.matmul %58, %59, %cst_18 {dimension_numbers = #tpu.dot_dimension_numbers<[1], [0], [0], [1], [0, 0, 1, 1], [], []>} : vector<17x17xbf16>, vector<17x8xbf16>, vector<17x8xf32> -> vector<17x8xf32>
    %61 = vector.extract_strided_slice %14 {offsets = [8, 0], sizes = [8, 32], strides = [1, 1]} : vector<32x32xf32> to vector<8x32xf32>
    %62 = arith.truncf %60 : vector<17x8xf32> to vector<17x8xbf16>
    %63 = arith.truncf %61 : vector<8x32xf32> to vector<8x32xbf16>
    %cst_19 = arith.constant dense<0.000000e+00> : vector<17x32xf32>
    %64 = tpu.matmul %62, %63, %cst_19 {dimension_numbers = #tpu.dot_dimension_numbers<[1], [0], [0], [1], [0, 0, 1, 1], [], []>} : vector<17x8xbf16>, vector<8x32xbf16>, vector<17x32xf32> -> vector<17x32xf32>
    %65 = arith.addf %40, %64 : vector<17x32xf32>
    %66 = vector.extract_strided_slice %11 {offsets = [0, 16], sizes = [17, 8], strides = [1, 1]} : vector<17x32xf32> to vector<17x8xf32>
    %67 = vector.extract_strided_slice %12 {offsets = [0, 16], sizes = [17, 8], strides = [1, 1]} : vector<17x32xf32> to vector<17x8xf32>
    %68 = vector.extract_strided_slice %13 {offsets = [0, 16], sizes = [17, 8], strides = [1, 1]} : vector<17x32xf32> to vector<17x8xf32>
    %69 = arith.truncf %66 : vector<17x8xf32> to vector<17x8xbf16>
    %70 = tpu.transpose %67, [1, 0] : vector<17x8xf32> -> vector<8x17xf32>
    %71 = arith.truncf %70 : vector<8x17xf32> to vector<8x17xbf16>
    %cst_20 = arith.constant dense<0.000000e+00> : vector<17x17xf32>
    %72 = tpu.matmul %69, %71, %cst_20 {dimension_numbers = #tpu.dot_dimension_numbers<[1], [0], [0], [1], [0, 0, 1, 1], [], []>} : vector<17x8xbf16>, vector<8x17xbf16>, vector<17x17xf32> -> vector<17x17xf32>
    %cst_21 = arith.constant dense<0xFF800000> : vector<17xf32>
    %73 = vector.multi_reduction <maximumf>, %72, %cst_21 [1] : vector<17x17xf32> to vector<17xf32>
    %74 = vector.shape_cast %73 : vector<17xf32> to vector<17x1xf32>
    %75 = vector.broadcast %74 : vector<17x1xf32> to vector<17x17xf32>
    %76 = arith.subf %72, %75 : vector<17x17xf32>
    %77 = math.exp %76 : vector<17x17xf32>
    %cst_22 = arith.constant dense<0.000000e+00> : vector<17xf32>
    %78 = vector.multi_reduction <add>, %77, %cst_22 [1] : vector<17x17xf32> to vector<17xf32>
    %79 = vector.shape_cast %78 : vector<17xf32> to vector<17x1xf32>
    %80 = tpu.reciprocal %79 {approx = true} : vector<17x1xf32> -> vector<17x1xf32>
    %81 = vector.broadcast %80 : vector<17x1xf32> to vector<17x17xf32>
    %82 = arith.mulf %77, %81 : vector<17x17xf32>
    %83 = arith.truncf %82 : vector<17x17xf32> to vector<17x17xbf16>
    %84 = arith.truncf %68 : vector<17x8xf32> to vector<17x8xbf16>
    %cst_23 = arith.constant dense<0.000000e+00> : vector<17x8xf32>
    %85 = tpu.matmul %83, %84, %cst_23 {dimension_numbers = #tpu.dot_dimension_numbers<[1], [0], [0], [1], [0, 0, 1, 1], [], []>} : vector<17x17xbf16>, vector<17x8xbf16>, vector<17x8xf32> -> vector<17x8xf32>
    %86 = vector.extract_strided_slice %14 {offsets = [16, 0], sizes = [8, 32], strides = [1, 1]} : vector<32x32xf32> to vector<8x32xf32>
    %87 = arith.truncf %85 : vector<17x8xf32> to vector<17x8xbf16>
    %88 = arith.truncf %86 : vector<8x32xf32> to vector<8x32xbf16>
    %cst_24 = arith.constant dense<0.000000e+00> : vector<17x32xf32>
    %89 = tpu.matmul %87, %88, %cst_24 {dimension_numbers = #tpu.dot_dimension_numbers<[1], [0], [0], [1], [0, 0, 1, 1], [], []>} : vector<17x8xbf16>, vector<8x32xbf16>, vector<17x32xf32> -> vector<17x32xf32>
    %90 = arith.addf %65, %89 : vector<17x32xf32>
    %91 = vector.extract_strided_slice %11 {offsets = [0, 24], sizes = [17, 8], strides = [1, 1]} : vector<17x32xf32> to vector<17x8xf32>
    %92 = vector.extract_strided_slice %12 {offsets = [0, 24], sizes = [17, 8], strides = [1, 1]} : vector<17x32xf32> to vector<17x8xf32>
    %93 = vector.extract_strided_slice %13 {offsets = [0, 24], sizes = [17, 8], strides = [1, 1]} : vector<17x32xf32> to vector<17x8xf32>
    %94 = arith.truncf %91 : vector<17x8xf32> to vector<17x8xbf16>
    %95 = tpu.transpose %92, [1, 0] : vector<17x8xf32> -> vector<8x17xf32>
    %96 = arith.truncf %95 : vector<8x17xf32> to vector<8x17xbf16>
    %cst_25 = arith.constant dense<0.000000e+00> : vector<17x17xf32>
    %97 = tpu.matmul %94, %96, %cst_25 {dimension_numbers = #tpu.dot_dimension_numbers<[1], [0], [0], [1], [0, 0, 1, 1], [], []>} : vector<17x8xbf16>, vector<8x17xbf16>, vector<17x17xf32> -> vector<17x17xf32>
    %cst_26 = arith.constant dense<0xFF800000> : vector<17xf32>
    %98 = vector.multi_reduction <maximumf>, %97, %cst_26 [1] : vector<17x17xf32> to vector<17xf32>
    %99 = vector.shape_cast %98 : vector<17xf32> to vector<17x1xf32>
    %100 = vector.broadcast %99 : vector<17x1xf32> to vector<17x17xf32>
    %101 = arith.subf %97, %100 : vector<17x17xf32>
    %102 = math.exp %101 : vector<17x17xf32>
    %cst_27 = arith.constant dense<0.000000e+00> : vector<17xf32>
    %103 = vector.multi_reduction <add>, %102, %cst_27 [1] : vector<17x17xf32> to vector<17xf32>
    %104 = vector.shape_cast %103 : vector<17xf32> to vector<17x1xf32>
    %105 = tpu.reciprocal %104 {approx = true} : vector<17x1xf32> -> vector<17x1xf32>
    %106 = vector.broadcast %105 : vector<17x1xf32> to vector<17x17xf32>
    %107 = arith.mulf %102, %106 : vector<17x17xf32>
    %108 = arith.truncf %107 : vector<17x17xf32> to vector<17x17xbf16>
    %109 = arith.truncf %93 : vector<17x8xf32> to vector<17x8xbf16>
    %cst_28 = arith.constant dense<0.000000e+00> : vector<17x8xf32>
    %110 = tpu.matmul %108, %109, %cst_28 {dimension_numbers = #tpu.dot_dimension_numbers<[1], [0], [0], [1], [0, 0, 1, 1], [], []>} : vector<17x17xbf16>, vector<17x8xbf16>, vector<17x8xf32> -> vector<17x8xf32>
    %111 = vector.extract_strided_slice %14 {offsets = [24, 0], sizes = [8, 32], strides = [1, 1]} : vector<32x32xf32> to vector<8x32xf32>
    %112 = arith.truncf %110 : vector<17x8xf32> to vector<17x8xbf16>
    %113 = arith.truncf %111 : vector<8x32xf32> to vector<8x32xbf16>
    %cst_29 = arith.constant dense<0.000000e+00> : vector<17x32xf32>
    %114 = tpu.matmul %112, %113, %cst_29 {dimension_numbers = #tpu.dot_dimension_numbers<[1], [0], [0], [1], [0, 0, 1, 1], [], []>} : vector<17x8xbf16>, vector<8x32xbf16>, vector<17x32xf32> -> vector<17x32xf32>
    %115 = arith.addf %90, %114 : vector<17x32xf32>
    %c0_30 = arith.constant 0 : index
    %c0_31 = arith.constant 0 : index
    %116 = vector.load %arg5[%c0_30, %c0_31] : memref<1x32xf32, #tpu.memory_space<vmem>>, vector<1x32xf32>
    %117 = vector.broadcast %116 : vector<1x32xf32> to vector<17x32xf32>
    %118 = arith.addf %115, %117 : vector<17x32xf32>
    %119 = arith.addf %1, %118 : vector<17x32xf32>
    %c0_32 = arith.constant 0 : index
    %c0_33 = arith.constant 0 : index
    %120 = vector.load %arg6[%c0_32, %c0_33] : memref<1x32xf32, #tpu.memory_space<vmem>>, vector<1x32xf32>
    %c0_34 = arith.constant 0 : index
    %c0_35 = arith.constant 0 : index
    %121 = vector.load %arg7[%c0_34, %c0_35] : memref<1x32xf32, #tpu.memory_space<vmem>>, vector<1x32xf32>
    %cst_36 = arith.constant dense<0.000000e+00> : vector<17xf32>
    %122 = vector.multi_reduction <add>, %119, %cst_36 [1] : vector<17x32xf32> to vector<17xf32>
    %123 = vector.shape_cast %122 : vector<17xf32> to vector<17x1xf32>
    %cst_37 = arith.constant 3.200000e+01 : f32
    %124 = vector.broadcast %cst_37 : f32 to vector<17x1xf32>
    %125 = arith.divf %123, %124 : vector<17x1xf32>
    %126 = vector.broadcast %125 : vector<17x1xf32> to vector<17x32xf32>
    %127 = arith.subf %119, %126 : vector<17x32xf32>
    %128 = arith.mulf %127, %127 : vector<17x32xf32>
    %cst_38 = arith.constant dense<0.000000e+00> : vector<17xf32>
    %129 = vector.multi_reduction <add>, %128, %cst_38 [1] : vector<17x32xf32> to vector<17xf32>
    %130 = vector.shape_cast %129 : vector<17xf32> to vector<17x1xf32>
    %cst_39 = arith.constant 3.200000e+01 : f32
    %131 = vector.broadcast %cst_39 : f32 to vector<17x1xf32>
    %132 = arith.divf %130, %131 : vector<17x1xf32>
    %133 = vector.broadcast %125 : vector<17x1xf32> to vector<17x32xf32>
    %134 = arith.subf %119, %133 : vector<17x32xf32>
    %cst_40 = arith.constant 9.99999974E-6 : f32
    %135 = vector.broadcast %cst_40 : f32 to vector<17x1xf32>
    %136 = arith.addf %132, %135 : vector<17x1xf32>
    %137 = math.rsqrt %136 : vector<17x1xf32>
    %138 = vector.broadcast %137 : vector<17x1xf32> to vector<17x32xf32>
    %139 = arith.mulf %134, %138 : vector<17x32xf32>
    %140 = vector.broadcast %120 : vector<1x32xf32> to vector<17x32xf32>
    %141 = arith.mulf %139, %140 : vector<17x32xf32>
    %142 = vector.broadcast %121 : vector<1x32xf32> to vector<17x32xf32>
    %143 = arith.addf %141, %142 : vector<17x32xf32>
    %c0_41 = arith.constant 0 : index
    %c0_42 = arith.constant 0 : index
    %144 = vector.load %arg8[%c0_41, %c0_42] : memref<32x64xf32, #tpu.memory_space<vmem>>, vector<32x64xf32>
    %145 = arith.truncf %143 : vector<17x32xf32> to vector<17x32xbf16>
    %146 = arith.truncf %144 : vector<32x64xf32> to vector<32x64xbf16>
    %cst_43 = arith.constant dense<0.000000e+00> : vector<17x64xf32>
    %147 = tpu.matmul %145, %146, %cst_43 {dimension_numbers = #tpu.dot_dimension_numbers<[1], [0], [0], [1], [0, 0, 1, 1], [], []>} : vector<17x32xbf16>, vector<32x64xbf16>, vector<17x64xf32> -> vector<17x64xf32>
    %c0_44 = arith.constant 0 : index
    %c0_45 = arith.constant 0 : index
    %148 = vector.load %arg9[%c0_44, %c0_45] : memref<1x64xf32, #tpu.memory_space<vmem>>, vector<1x64xf32>
    %149 = vector.broadcast %148 : vector<1x64xf32> to vector<17x64xf32>
    %150 = arith.addf %147, %149 : vector<17x64xf32>
    %cst_46 = arith.constant 0.000000e+00 : f32
    %151 = vector.broadcast %cst_46 : f32 to vector<17x64xf32>
    %152 = arith.maximumf %150, %151 : vector<17x64xf32>
    %c0_47 = arith.constant 0 : index
    %c0_48 = arith.constant 0 : index
    %153 = vector.load %arg10[%c0_47, %c0_48] : memref<64x32xf32, #tpu.memory_space<vmem>>, vector<64x32xf32>
    %154 = arith.truncf %152 : vector<17x64xf32> to vector<17x64xbf16>
    %155 = arith.truncf %153 : vector<64x32xf32> to vector<64x32xbf16>
    %cst_49 = arith.constant dense<0.000000e+00> : vector<17x32xf32>
    %156 = tpu.matmul %154, %155, %cst_49 {dimension_numbers = #tpu.dot_dimension_numbers<[1], [0], [0], [1], [0, 0, 1, 1], [], []>} : vector<17x64xbf16>, vector<64x32xbf16>, vector<17x32xf32> -> vector<17x32xf32>
    %c0_50 = arith.constant 0 : index
    %c0_51 = arith.constant 0 : index
    %157 = vector.load %arg11[%c0_50, %c0_51] : memref<1x32xf32, #tpu.memory_space<vmem>>, vector<1x32xf32>
    %158 = vector.broadcast %157 : vector<1x32xf32> to vector<17x32xf32>
    %159 = arith.addf %156, %158 : vector<17x32xf32>
    %160 = arith.addf %143, %159 : vector<17x32xf32>
    %c0_52 = arith.constant 0 : index
    %c0_53 = arith.constant 0 : index
    %161 = vector.load %arg12[%c0_52, %c0_53] : memref<1x32xf32, #tpu.memory_space<vmem>>, vector<1x32xf32>
    %c0_54 = arith.constant 0 : index
    %c0_55 = arith.constant 0 : index
    %162 = vector.load %arg13[%c0_54, %c0_55] : memref<1x32xf32, #tpu.memory_space<vmem>>, vector<1x32xf32>
    %cst_56 = arith.constant dense<0.000000e+00> : vector<17xf32>
    %163 = vector.multi_reduction <add>, %160, %cst_56 [1] : vector<17x32xf32> to vector<17xf32>
    %164 = vector.shape_cast %163 : vector<17xf32> to vector<17x1xf32>
    %cst_57 = arith.constant 3.200000e+01 : f32
    %165 = vector.broadcast %cst_57 : f32 to vector<17x1xf32>
    %166 = arith.divf %164, %165 : vector<17x1xf32>
    %167 = vector.broadcast %166 : vector<17x1xf32> to vector<17x32xf32>
    %168 = arith.subf %160, %167 : vector<17x32xf32>
    %169 = arith.mulf %168, %168 : vector<17x32xf32>
    %cst_58 = arith.constant dense<0.000000e+00> : vector<17xf32>
    %170 = vector.multi_reduction <add>, %169, %cst_58 [1] : vector<17x32xf32> to vector<17xf32>
    %171 = vector.shape_cast %170 : vector<17xf32> to vector<17x1xf32>
    %cst_59 = arith.constant 3.200000e+01 : f32
    %172 = vector.broadcast %cst_59 : f32 to vector<17x1xf32>
    %173 = arith.divf %171, %172 : vector<17x1xf32>
    %174 = vector.broadcast %166 : vector<17x1xf32> to vector<17x32xf32>
    %175 = arith.subf %160, %174 : vector<17x32xf32>
    %cst_60 = arith.constant 9.99999974E-6 : f32
    %176 = vector.broadcast %cst_60 : f32 to vector<17x1xf32>
    %177 = arith.addf %173, %176 : vector<17x1xf32>
    %178 = math.rsqrt %177 : vector<17x1xf32>
    %179 = vector.broadcast %178 : vector<17x1xf32> to vector<17x32xf32>
    %180 = arith.mulf %175, %179 : vector<17x32xf32>
    %181 = vector.broadcast %161 : vector<1x32xf32> to vector<17x32xf32>
    %182 = arith.mulf %180, %181 : vector<17x32xf32>
    %183 = vector.broadcast %162 : vector<1x32xf32> to vector<17x32xf32>
    %184 = arith.addf %182, %183 : vector<17x32xf32>
    %c0_61 = arith.constant 0 : index
    %c0_62 = arith.constant 0 : index
    %c0_63 = arith.constant 0 : index
    %185 = vector.load %arg14[%c0_61, %c0_62, %c0_63] : memref<1x17x32xf32, #tpu.memory_space<vmem>>, vector<1x17x32xf32>
    %186 = vector.shape_cast %185 : vector<1x17x32xf32> to vector<17x32xf32>
    %187 = vector.shape_cast %184 : vector<17x32xf32> to vector<1x17x32xf32>
    tpu.vector_store %arg14[%c0_61, %c0_62, %c0_63], %187 {strides = array<i32>} : memref<1x17x32xf32, #tpu.memory_space<vmem>>, vector<1x17x32xf32>,
    return
  }
  func.func @transform_0(%arg0: i32) -> (i32, i32, i32) {
    %c0_i32 = arith.constant 0 : i32
    %c0_i32_0 = arith.constant 0 : i32
    %c0_i32_1 = arith.constant 0 : i32
    return %arg0, %c0_i32, %c0_i32_0 : i32, i32, i32
  }
  func.func @transform_1(%arg0: i32) -> (i32, i32) {
    %c0_i32 = arith.constant 0 : i32
    %c0_i32_0 = arith.constant 0 : i32
    %c0_i32_1 = arith.constant 0 : i32
    return %c0_i32, %c0_i32_0 : i32, i32
  }
  func.func @transform_2(%arg0: i32) -> (i32, i32) {
    %c0_i32 = arith.constant 0 : i32
    %c0_i32_0 = arith.constant 0 : i32
    %c0_i32_1 = arith.constant 0 : i32
    return %c0_i32, %c0_i32_0 : i32, i32
  }
  func.func @transform_3(%arg0: i32) -> (i32, i32) {
    %c0_i32 = arith.constant 0 : i32
    %c0_i32_0 = arith.constant 0 : i32
    %c0_i32_1 = arith.constant 0 : i32
    return %c0_i32, %c0_i32_0 : i32, i32
  }
  func.func @transform_4(%arg0: i32) -> (i32, i32) {
    %c0_i32 = arith.constant 0 : i32
    %c0_i32_0 = arith.constant 0 : i32
    %c0_i32_1 = arith.constant 0 : i32
    return %c0_i32, %c0_i32_0 : i32, i32
  }
  func.func @transform_5(%arg0: i32) -> (i32, i32) {
    %c0_i32 = arith.constant 0 : i32
    %c0_i32_0 = arith.constant 0 : i32
    %c0_i32_1 = arith.constant 0 : i32
    return %c0_i32, %c0_i32_0 : i32, i32
  }
  func.func @transform_6(%arg0: i32) -> (i32, i32) {
    %c0_i32 = arith.constant 0 : i32
    %c0_i32_0 = arith.constant 0 : i32
    %c0_i32_1 = arith.constant 0 : i32
    return %c0_i32, %c0_i32_0 : i32, i32
  }
  func.func @transform_7(%arg0: i32) -> (i32, i32) {
    %c0_i32 = arith.constant 0 : i32
    %c0_i32_0 = arith.constant 0 : i32
    %c0_i32_1 = arith.constant 0 : i32
    return %c0_i32, %c0_i32_0 : i32, i32
  }
  func.func @transform_8(%arg0: i32) -> (i32, i32) {
    %c0_i32 = arith.constant 0 : i32
    %c0_i32_0 = arith.constant 0 : i32
    %c0_i32_1 = arith.constant 0 : i32
    return %c0_i32, %c0_i32_0 : i32, i32
  }
  func.func @transform_9(%arg0: i32) -> (i32, i32) {
    %c0_i32 = arith.constant 0 : i32
    %c0_i32_0 = arith.constant 0 : i32
    %c0_i32_1 = arith.constant 0 : i32
    return %c0_i32, %c0_i32_0 : i32, i32
  }
  func.func @transform_10(%arg0: i32) -> (i32, i32) {
    %c0_i32 = arith.constant 0 : i32
    %c0_i32_0 = arith.constant 0 : i32
    %c0_i32_1 = arith.constant 0 : i32
    return %c0_i32, %c0_i32_0 : i32, i32
  }
  func.func @transform_11(%arg0: i32) -> (i32, i32) {
    %c0_i32 = arith.constant 0 : i32
    %c0_i32_0 = arith.constant 0 : i32
    %c0_i32_1 = arith.constant 0 : i32
    return %c0_i32, %c0_i32_0 : i32, i32
  }
  func.func @transform_12(%arg0: i32) -> (i32, i32) {
    %c0_i32 = arith.constant 0 : i32
    %c0_i32_0 = arith.constant 0 : i32
    %c0_i32_1 = arith.constant 0 : i32
    return %c0_i32, %c0_i32_0 : i32, i32
  }
  func.func @transform_13(%arg0: i32) -> (i32, i32, i32) {
    %c0_i32 = arith.constant 0 : i32
    %c0_i32_0 = arith.constant 0 : i32
    %c0_i32_1 = arith.constant 0 : i32
    return %arg0, %c0_i32, %c0_i32_0 : i32, i32, i32
  }
}

module attributes {stable_mosaic.version = 11 : i64} {
  func.func @_final_norm_kernel(%arg0: i32, %arg1: memref<2x32xf32, #tpu.memory_space<vmem>>, %arg2: memref<1x32xf32, #tpu.memory_space<vmem>>, %arg3: memref<1x32xf32, #tpu.memory_space<vmem>>, %arg4: memref<1x32xf32, #tpu.memory_space<vmem>>, %arg5: memref<1x32xf32, #tpu.memory_space<vmem>>, %arg6: memref<2x32xf32, #tpu.memory_space<vmem>>) attributes {dimension_semantics = [#tpu.dimension_semantics<arbitrary>], iteration_bounds = array<i64: 1>, scalar_prefetch = 0 : i64, scratch_operands = 0 : i64, tpu.core_type = #tpu.core_type<tc>, window_params = [{pipeline_mode = #tpu.pipeline_mode<synchronous>, transform_indices = @transform_0, window_bounds = array<i64: 2, 32>}, {pipeline_mode = #tpu.pipeline_mode<synchronous>, transform_indices = @transform_1, window_bounds = array<i64: 1, 32>}, {pipeline_mode = #tpu.pipeline_mode<synchronous>, transform_indices = @transform_2, window_bounds = array<i64: 1, 32>}, {pipeline_mode = #tpu.pipeline_mode<synchronous>, transform_indices = @transform_3, window_bounds = array<i64: 1, 32>}, {pipeline_mode = #tpu.pipeline_mode<synchronous>, transform_indices = @transform_4, window_bounds = array<i64: 1, 32>}, {pipeline_mode = #tpu.pipeline_mode<synchronous>, transform_indices = @transform_5, window_bounds = array<i64: 2, 32>}]} {
    %c0 = arith.constant 0 : index
    %c0_0 = arith.constant 0 : index
    %0 = vector.load %arg1[%c0, %c0_0] : memref<2x32xf32, #tpu.memory_space<vmem>>, vector<2x32xf32>
    %c0_1 = arith.constant 0 : index
    %c0_2 = arith.constant 0 : index
    %1 = vector.load %arg2[%c0_1, %c0_2] : memref<1x32xf32, #tpu.memory_space<vmem>>, vector<1x32xf32>
    %c0_3 = arith.constant 0 : index
    %c0_4 = arith.constant 0 : index
    %2 = vector.load %arg3[%c0_3, %c0_4] : memref<1x32xf32, #tpu.memory_space<vmem>>, vector<1x32xf32>
    %cst = arith.constant dense<0.000000e+00> : vector<2xf32>
    %3 = vector.multi_reduction <add>, %0, %cst [1] : vector<2x32xf32> to vector<2xf32>
    %4 = vector.shape_cast %3 : vector<2xf32> to vector<2x1xf32>
    %cst_5 = arith.constant 3.200000e+01 : f32
    %5 = vector.broadcast %cst_5 : f32 to vector<2x1xf32>
    %6 = arith.divf %4, %5 : vector<2x1xf32>
    %7 = vector.broadcast %6 : vector<2x1xf32> to vector<2x32xf32>
    %8 = arith.subf %0, %7 : vector<2x32xf32>
    %9 = arith.mulf %8, %8 : vector<2x32xf32>
    %cst_6 = arith.constant dense<0.000000e+00> : vector<2xf32>
    %10 = vector.multi_reduction <add>, %9, %cst_6 [1] : vector<2x32xf32> to vector<2xf32>
    %11 = vector.shape_cast %10 : vector<2xf32> to vector<2x1xf32>
    %cst_7 = arith.constant 3.200000e+01 : f32
    %12 = vector.broadcast %cst_7 : f32 to vector<2x1xf32>
    %13 = arith.divf %11, %12 : vector<2x1xf32>
    %14 = vector.broadcast %6 : vector<2x1xf32> to vector<2x32xf32>
    %15 = arith.subf %0, %14 : vector<2x32xf32>
    %cst_8 = arith.constant 9.99999974E-6 : f32
    %16 = vector.broadcast %cst_8 : f32 to vector<2x1xf32>
    %17 = arith.addf %13, %16 : vector<2x1xf32>
    %18 = math.rsqrt %17 : vector<2x1xf32>
    %19 = vector.broadcast %18 : vector<2x1xf32> to vector<2x32xf32>
    %20 = arith.mulf %15, %19 : vector<2x32xf32>
    %21 = vector.broadcast %1 : vector<1x32xf32> to vector<2x32xf32>
    %22 = arith.mulf %20, %21 : vector<2x32xf32>
    %23 = vector.broadcast %2 : vector<1x32xf32> to vector<2x32xf32>
    %24 = arith.addf %22, %23 : vector<2x32xf32>
    %c0_9 = arith.constant 0 : index
    %c0_10 = arith.constant 0 : index
    %25 = vector.load %arg4[%c0_9, %c0_10] : memref<1x32xf32, #tpu.memory_space<vmem>>, vector<1x32xf32>
    %c0_11 = arith.constant 0 : index
    %c0_12 = arith.constant 0 : index
    %26 = vector.load %arg5[%c0_11, %c0_12] : memref<1x32xf32, #tpu.memory_space<vmem>>, vector<1x32xf32>
    %cst_13 = arith.constant dense<0.000000e+00> : vector<2xf32>
    %27 = vector.multi_reduction <add>, %24, %cst_13 [1] : vector<2x32xf32> to vector<2xf32>
    %28 = vector.shape_cast %27 : vector<2xf32> to vector<2x1xf32>
    %cst_14 = arith.constant 3.200000e+01 : f32
    %29 = vector.broadcast %cst_14 : f32 to vector<2x1xf32>
    %30 = arith.divf %28, %29 : vector<2x1xf32>
    %31 = vector.broadcast %30 : vector<2x1xf32> to vector<2x32xf32>
    %32 = arith.subf %24, %31 : vector<2x32xf32>
    %33 = arith.mulf %32, %32 : vector<2x32xf32>
    %cst_15 = arith.constant dense<0.000000e+00> : vector<2xf32>
    %34 = vector.multi_reduction <add>, %33, %cst_15 [1] : vector<2x32xf32> to vector<2xf32>
    %35 = vector.shape_cast %34 : vector<2xf32> to vector<2x1xf32>
    %cst_16 = arith.constant 3.200000e+01 : f32
    %36 = vector.broadcast %cst_16 : f32 to vector<2x1xf32>
    %37 = arith.divf %35, %36 : vector<2x1xf32>
    %38 = vector.broadcast %30 : vector<2x1xf32> to vector<2x32xf32>
    %39 = arith.subf %24, %38 : vector<2x32xf32>
    %cst_17 = arith.constant 9.99999974E-6 : f32
    %40 = vector.broadcast %cst_17 : f32 to vector<2x1xf32>
    %41 = arith.addf %37, %40 : vector<2x1xf32>
    %42 = math.rsqrt %41 : vector<2x1xf32>
    %43 = vector.broadcast %42 : vector<2x1xf32> to vector<2x32xf32>
    %44 = arith.mulf %39, %43 : vector<2x32xf32>
    %45 = vector.broadcast %25 : vector<1x32xf32> to vector<2x32xf32>
    %46 = arith.mulf %44, %45 : vector<2x32xf32>
    %47 = vector.broadcast %26 : vector<1x32xf32> to vector<2x32xf32>
    %48 = arith.addf %46, %47 : vector<2x32xf32>
    %c0_18 = arith.constant 0 : index
    %c0_19 = arith.constant 0 : index
    %49 = vector.load %arg6[%c0_18, %c0_19] : memref<2x32xf32, #tpu.memory_space<vmem>>, vector<2x32xf32>
    tpu.vector_store %arg6[%c0_18, %c0_19], %48 {strides = array<i32>} : memref<2x32xf32, #tpu.memory_space<vmem>>, vector<2x32xf32>,
    return
  }
  func.func @transform_0(%arg0: i32) -> (i32, i32) {
    %c0_i32 = arith.constant 0 : i32
    %c0_i32_0 = arith.constant 0 : i32
    %c0_i32_1 = arith.constant 0 : i32
    return %c0_i32, %c0_i32_0 : i32, i32
  }
  func.func @transform_1(%arg0: i32) -> (i32, i32) {
    %c0_i32 = arith.constant 0 : i32
    %c0_i32_0 = arith.constant 0 : i32
    %c0_i32_1 = arith.constant 0 : i32
    return %c0_i32, %c0_i32_0 : i32, i32
  }
  func.func @transform_2(%arg0: i32) -> (i32, i32) {
    %c0_i32 = arith.constant 0 : i32
    %c0_i32_0 = arith.constant 0 : i32
    %c0_i32_1 = arith.constant 0 : i32
    return %c0_i32, %c0_i32_0 : i32, i32
  }
  func.func @transform_3(%arg0: i32) -> (i32, i32) {
    %c0_i32 = arith.constant 0 : i32
    %c0_i32_0 = arith.constant 0 : i32
    %c0_i32_1 = arith.constant 0 : i32
    return %c0_i32, %c0_i32_0 : i32, i32
  }
  func.func @transform_4(%arg0: i32) -> (i32, i32) {
    %c0_i32 = arith.constant 0 : i32
    %c0_i32_0 = arith.constant 0 : i32
    %c0_i32_1 = arith.constant 0 : i32
    return %c0_i32, %c0_i32_0 : i32, i32
  }
  func.func @transform_5(%arg0: i32) -> (i32, i32) {
    %c0_i32 = arith.constant 0 : i32
    %c0_i32_0 = arith.constant 0 : i32
    %c0_i32_1 = arith.constant 0 : i32
    return %c0_i32, %c0_i32_0 : i32, i32
  }
}

</mosaic_0001>

<bundles_post_ra>
// kernel: vit_forward.4
= control target key start
LH: loop header
LB: loop body
LE: loop exit
PB: predicated region body
PF: predicated region fallthrough
CT: control target
= control target key end

     0   :  { %vm40_vm0 = vcmask 523264   ;;  %vm96_vm1 = vcmask 261120   ;;  %s199_s1 = inlined_call_operand.vmem [shape: f32[64,32], index: 1, kind: input, shape index: {}]   ;;  %s200_s0 = inlined_call_operand.vmem [shape: f32[32,64], index: 0, kind: input, shape index: {}]   ;;  %s201_s2 = inlined_call_operand.vmem [shape: f32[1,32], index: 2, kind: input, shape index: {}]   ;;  %s202_s3 = inlined_call_operand.vmem [shape: f32[32,32], index: 3, kind: output, shape index: {}]  }
   0x1   :  { %v25_v0 = vld [vmem:[%s199_s1 + $0x30] sm:$0xff]  ;;  %v26_v1 = vld [vmem:[%s199_s1 + $0x38] sm:$0xff]  ;;  %v23_v2 = vld [vmem:[%s199_s1 + $0x20] sm:$0xff] }
   0x2   :  { %v32_v3 = vpack.c.bf16 %v26_v1, %v25_v0  ;;  %v24_v4 = vld [vmem:[%s199_s1 + $0x28] sm:$0xff]  ;;  %v21_v6 = vld [vmem:[%s199_s1 + $0x10] sm:$0xff]  ;;  %v22_v7 = vld [vmem:[%s199_s1 + $0x18] sm:$0xff] }
   0x3   :  { %v31_v5 = vpack.c.bf16 %v24_v4, %v23_v2  ;;  %v15_v8 = vld [vmem:[%s200_s0] sm:$0xff]  ;;  %v16_v9 = vld [vmem:[%s200_s0 + $0x8] sm:$0xff]  ;;  %v30_v11 = vpack.c.bf16 %v22_v7, %v21_v6  ;;  %v17_v15 = vld [vmem:[%s200_s0 + $0x10] sm:$0xff] }
   0x4   :  { %114 = vmatprep.subr.bf16.mxu0 %v32_v3  ;;  %v27_v10 = vpack.c.bf16 %v16_v9, %v15_v8  ;;  %v19_v12 = vld [vmem:[%s199_s1] sm:$0xff]  ;;  %v20_v13 = vld [vmem:[%s199_s1 + $0x8] sm:$0xff]  ;;  %v18_v16 = vld [vmem:[%s200_s0 + $0x18] sm:$0xff] }
   0x5   :  { %115 = vmatpush3.bf16.msra.mxu0 %v32_v3  ;;  %v29_v14 = vpack.c.bf16 %v20_v13, %v19_v12  ;;  %v28_v17 = vpack.c.bf16 %v18_v16, %v17_v15  ;;  %v105_v18 = vld [vmem:[%s201_s2] ss:$0 sm:$0xff] }
   0x6   :  { %116 = vmatprep.subr.bf16.mxu0 %v31_v5  ;;  %122 = vmatprep.mubr.msk.bf16.mxu0 %vm40_vm0, %v27_v10 }
   0x9   :  { %117 = vmatpush3.bf16.msra.mxu0 %v31_v5 }
   0xa   :  { %118 = vmatprep.subr.bf16.mxu0 %v30_v11 }
   0xd   :  { %119 = vmatpush3.bf16.msra.mxu0 %v30_v11 }
   0xe   :  { %120 = vmatprep.subr.bf16.mxu0 %v29_v14 }
  0x11   :  { %121 = vmatpush3.bf16.msra.mxu0 %v29_v14 }
  0x14   :  { %123 = vmatmul.mubr.msk.bf16.vlgmr.msra.gmra.mxu0 %vm40_vm0, %v28_v17 }
  0xd4   :  { %v124_v19 = vpop.f32.mrf.mxu0 }
  0xd5   :  { %v90_v20 = vadd.f32 %v124_v19, %v105_v18 }
  0xd6   :  { %v81_v21 = vpop.f32.mrf.mxu0 }
  0xd7   :  { %99 = vst.msk [vmem:[%s202_s3 + $0x10] sm:$0xff] %vm96_vm1, %v90_v20  ;;  %v82_v22 = vadd.f32 %v105_v18, %v81_v21 }
  0xd8   :  { %v125_v23 = vpop.f32.mrf.mxu0 }
  0xd9   :  { %97 = vst.msk [vmem:[%s202_s3] sm:$0xff] %vm96_vm1, %v82_v22  ;;  %v93_v24 = vadd.f32 %v125_v23, %v105_v18 }
  0xda   :  { %v84_v25 = vpop.f32.mrf.mxu0 }
  0xdb   :  { %100 = vst.msk [vmem:[%s202_s3 + $0x18] sm:$0xff] %vm96_vm1, %v93_v24  ;;  %v85_v26 = vadd.f32 %v105_v18, %v84_v25 }
  0xdd   :  { %98 = vst.msk [vmem:[%s202_s3 + $0x8] sm:$0xff] %vm96_vm1, %v85_v26 }

// kernel: vit_forward.7
= control target key start
LH: loop header
LB: loop body
LE: loop exit
PB: predicated region body
PF: predicated region fallthrough
CT: control target
= control target key end

     0   :  { %vm23_vm0 = vcmask 254976   ;;  %s147_s0 = inlined_call_operand.vmem [shape: f32[2,32], index: 0, kind: input, shape index: {}]   ;;  %s148_s1 = inlined_call_operand.vmem [shape: f32[1,32], index: 1, kind: input, shape index: {}]   ;;  %s149_s2 = inlined_call_operand.vmem [shape: f32[1,32], index: 2, kind: input, shape index: {}]   ;;  %s150_s3 = inlined_call_operand.vmem [shape: f32[1,32], index: 3, kind: input, shape index: {}]   ;;  %s151_s4 = inlined_call_operand.vmem [shape: f32[1,32], index: 4, kind: input, shape index: {}]   ;;  %s152_s5 = inlined_call_operand.vmem [shape: f32[2,32], index: 5, kind: output, shape index: {}]  }
   0x1   :  { %v20_v0 = vld [vmem:[%s147_s0] sm:$0x3] }
   0x2   :  { %v24_v1 = vsel %vm23_vm0, %v20_v0, 0.0  ;;  %v86_v11 = vld [vmem:[%s148_s1] ss:$0 sm:$0xff] }
   0x3   :  { %25 = vadd.xlane.f32.xlu0 %v24_v1  ;;  %v87_v13 = vld [vmem:[%s149_s2] ss:$0 sm:$0xff] }
   0x4   :  { %v88_v26 = vld [vmem:[%s150_s3] ss:$0 sm:$0xff] }
   0x5   :  { %v89_v28 = vld [vmem:[%s151_s4] ss:$0 sm:$0xff] }
  0x8c   :  { %v26_v2 = vpop.xlane.xlu0 %25 }
  0x8d   :  { %v28_v3 = vmul.f32 0.03125, %v26_v2 }
  0x8f   :  { %v29_v4 = vsub.f32 %v20_v0, %v28_v3 }
  0x91   :  { %v30_v5 = vmul.f32 %v29_v4, %v29_v4 }
  0x93   :  { %v31_v6 = vsel %vm23_vm0, %v30_v5, 0.0 }
  0x94   :  { %32 = vadd.xlane.f32.xlu0 %v31_v6 }
 0x11d   :  { %v33_v7 = vpop.xlane.xlu0 %32 }
 0x11e   :  { %v34_v8 = vmul.f32 0.03125, %v33_v7 }
 0x120   :  { %v35_v9 = vadd.f32 1e-05, %v34_v8 }
 0x122   :  { %90 = vrsqrt.f32 %v35_v9 }
 0x12f   :  { %v91_v10 = vpop.eup %90 }
 0x130   :  { %v37_v12 = vmul.f32 %v91_v10, %v29_v4 }
 0x132   :  { %v44_v14 = vmul.f32 %v86_v11, %v37_v12 }
 0x134   :  { %v51_v15 = vadd.f32 %v87_v13, %v44_v14 }
 0x136   :  { %v54_v16 = vsel %vm23_vm0, %v51_v15, 0.0 }
 0x137   :  { %55 = vadd.xlane.f32.xlu1 %v54_v16 }
 0x1c0   :  { %v56_v17 = vpop.xlane.xlu1 %55 }
 0x1c1   :  { %v57_v18 = vmul.f32 0.03125, %v56_v17 }
 0x1c3   :  { %v58_v19 = vsub.f32 %v51_v15, %v57_v18 }
 0x1c5   :  { %v59_v20 = vmul.f32 %v58_v19, %v58_v19 }
 0x1c7   :  { %v60_v21 = vsel %vm23_vm0, %v59_v20, 0.0 }
 0x1c8   :  { %61 = vadd.xlane.f32.xlu1 %v60_v21 }
 0x251   :  { %v62_v22 = vpop.xlane.xlu1 %61 }
 0x252   :  { %v63_v23 = vmul.f32 0.03125, %v62_v22 }
 0x254   :  { %v64_v24 = vadd.f32 1e-05, %v63_v23 }
 0x256   :  { %92 = vrsqrt.f32 %v64_v24 }
 0x263   :  { %v93_v25 = vpop.eup %92 }
 0x264   :  { %v66_v27 = vmul.f32 %v93_v25, %v58_v19 }
 0x266   :  { %v73_v29 = vmul.f32 %v88_v26, %v66_v27 }
 0x268   :  { %v80_v30 = vadd.f32 %v89_v28, %v73_v29 }
 0x26a   :  { %81 = vst.msk [vmem:[%s152_s5] sm:$0x3] %vm23_vm0, %v80_v30 }

// kernel: vit_forward.5
= control target key start
LH: loop header
LB: loop body
LE: loop exit
PB: predicated region body
PF: predicated region fallthrough
CT: control target
= control target key end

     0   :  { %s2318_s25 = smov 0   ;;  %s2603_s0 = inlined_call_operand.vmem [shape: f32[2,17,32], index: 0, kind: input, shape index: {}]   ;;  %s2604_s1 = inlined_call_operand.vmem [shape: f32[32,96], index: 1, kind: input, shape index: {}]   ;;  %s2605_s2 = inlined_call_operand.vmem [shape: f32[1,96], index: 2, kind: input, shape index: {}]   ;;  %s2606_s3 = inlined_call_operand.vmem [shape: f32[32,32], index: 3, kind: input, shape index: {}]   ;;  %s2607_s4 = inlined_call_operand.vmem [shape: f32[1,32], index: 4, kind: input, shape index: {}]   ;;  %s2608_s5 = inlined_call_operand.vmem [shape: f32[1,32], index: 5, kind: input, shape index: {}]   ;;  %s2609_s6 = inlined_call_operand.vmem [shape: f32[1,32], index: 6, kind: input, shape index: {}]   ;;  %s2610_s7 = inlined_call_operand.vmem [shape: f32[32,64], index: 7, kind: input, shape index: {}]   ;;  %s2611_s8 = inlined_call_operand.vmem [shape: f32[1,64], index: 8, kind: input, shape index: {}]   ;;  %s2612_s9 = inlined_call_operand.vmem [shape: f32[64,32], index: 9, kind: input, shape index: {}]   ;;  %s2613_s10 = inlined_call_operand.vmem [shape: f32[1,32], index: 10, kind: input, shape index: {}]   ;;  %s2614_s11 = inlined_call_operand.vmem [shape: f32[1,32], index: 11, kind: input, shape index: {}]   ;;  %s2615_s12 = inlined_call_operand.vmem [shape: f32[1,32], index: 12, kind: input, shape index: {}]   ;;  %s2616_s13 = inlined_call_operand.vmem [shape: f32[2,17,32], index: 13, kind: output, shape index: {}]  }
   0x1 LB: > { %s1924_s26 = sadd.s32 4294967295, %s2234_s25   ;;  %p1928_p0 = scmp.ge.s32.totalorder %s2234_s25, 1  ;;  %s2234_s25 = sphi %s2318_s25, %s23_s25  }
   0x2   : > { %p387_p1 = scmp.lt.s32.totalorder %s2234_s25, 3 }
   0x4   : > { %p388_p2 = pnand %p1928_p0, %p387_p1 }
   0x5   : > { %p431_p3 = scmp.lt.s32.totalorder (!%p388_p2), %s1924_s26, 1  ;;  %s2236_s24 = smov (!%p388_p2), 96  }
   0x6   : > { %391 = sbr.rel (%p388_p2) target bundleno = 3753 (0xea9), region = 72  ;;  %s2237_s27 = smov (!%p388_p2), 88  }
   0x7   : > { %s2238_s28 = smov (!%p388_p2), 120   ;;  %s2239_s29 = smov (!%p388_p2), 64  }
   0x8   : > { %s2241_s30 = smov (!%p388_p2), 56   ;;  %s2242_s14 = smov (!%p388_p2), 80  }
   0x9   : > { %s2243_s15 = smov (!%p388_p2), 112   ;;  %s2244_s19 = smov (!%p388_p2), 72  }
   0xa   : > { %s2245_s22 = smov (!%p388_p2), 48   ;;  %s2246_s23 = smov (!%p388_p2), 104  }
   0xb   : > { %v447_v0 = vld [vmem:[%s2604_s1 + $0x10] sm:$0xff]  ;;  %v448_v1 = vld [vmem:[%s2604_s1 + $0x18] sm:$0xff]  ;;  %v445_v2 = vld [vmem:[%s2604_s1] sm:$0xff]  ;;  %s2618_s26 = smov (!%p431_p3, %s1924_s26), 1  ;;  %vm460_vm0 = vcmask 261120   ;;  %vm569_vm1 = vcmask 64512  }
   0xc   : > { %v452_v3 = vpack.c.bf16 %v448_v1, %v447_v0  ;;  %v446_v4 = vld [vmem:[%s2604_s1 + $0x8] sm:$0xff]  ;;  %s2141_s18 = smul.u32 24, %s2618_s26  ;;  %v1931_v11 = vld [vmem:[%s2605_s2] ss:$0 sm:$0xff]  ;;  %vm576_vm2 = vcmask 1043456   ;;  %vm628_vm3 = vcmask 138240  }
   0xd   : > { %v451_v5 = vpack.c.bf16 %v446_v4, %v445_v2  ;;  %vm635_vm4 = vcmask 131072   ;;  %vm680_vm5 = vcmask 1040384   ;;  %vm1603_vm6 = vcmask 253952  }
   0xe   : > { %2025 = vmatprep.subr.bf16.mxu0 %v452_v3  ;;  %s435_s21 = scalar_lea.vmem %s2603_s0, %s2141_s18  ;;  %vm1749_vm7 = vcmask 523264  }
   0xf   : > { %2026 = vmatpush3.bf16.msra.mxu0 %v452_v3  ;;  %v2346_v6 = vld [vmem:[%s435_s21] sm:$0xff]  ;;  %v2348_v7 = vld [vmem:[%s435_s21 + $0x8] sm:$0xff]  ;;  %v2350_v8 = vld [vmem:[%s435_s21 + $0x10] sm:$0x1]  ;;  %v2240_v3 = vmov 0  }
  0x10   : > { %2027 = vmatprep.subr.bf16.mxu0 %v451_v5  ;;  %v449_v9 = vpack.c.bf16 %v2348_v7, %v2346_v6  ;;  %v450_v10 = vpack.c.bf16 %v2350_v8, %v2350_v8  ;;  %v2404_v4 = vsel %vm680_vm5, 65535, %v2240_v3 }
  0x12   : > { %2029 = vmatprep.mubr.msk.bf16.mxu0 %vm460_vm0, %v449_v9 }
  0x13   : > { %2028 = vmatpush3.bf16.msra.mxu0 %v451_v5 }
  0x16   : > { %2030 = vmatmul.mubr.msk.bf16.vlgmr.msra.gmra.mxu0 %vm460_vm0, %v450_v10 }
  0xd6   : > { %v2031_v12 = vpop.f32.mrf.mxu0 }
  0xd7   : > { %v2361_v13 = vadd.f32 %v2031_v12, %v1931_v11 }
  0xd8   : > { %v501_v14 = vpop.f32.mrf.mxu0 }
  0xd9   : > { %v2363_v15 = vadd.f32 %v1931_v11, %v501_v14  ;;  %531 = vrot.lane.b32.xlu1 %v2361_v13, %s2236_s24  ;;  %v517_v21 = vmul.f32 0.35355338, %v2361_v13  ;;  %v2400_v52 = vpack.c.bf16 %v2361_v13, %v2361_v13 }
  0xda   : > { %v2032_v16 = vpop.f32.mrf.mxu0 }
  0xdb   : > { %527 = vrot.lane.b32.xlu0 %v2363_v15, %s2236_s24  ;;  %v515_v19 = vmul.f32 0.35355338, %v2363_v15  ;;  %v2380_v23 = vpack.c.bf16 %v517_v21, %v517_v21 }
  0xdc   : > { %v504_v17 = vpop.f32.mrf.mxu0 }
  0xdd   : > { %v2367_v18 = vadd.f32 %v1931_v11, %v504_v17  ;;  %737 = vrot.lane.b32.xlu1 %v2363_v15, %s2237_s27 }
  0xdf   : > { %529 = vrot.lane.b32.xlu0 %v2367_v18, %s2236_s24  ;;  %v516_v20 = vmul.f32 0.35355338, %v2367_v18 }
  0xe1   : > { %741 = vrot.lane.b32.xlu1 %v2361_v13, %s2237_s27  ;;  %v2375_v22 = vpack.c.bf16 %v516_v20, %v515_v19 }
  0xe3   : > { %739 = vrot.lane.b32.xlu0 %v2367_v18, %s2237_s27  ;;  %2035 = vmatprep.mubr.msk.bf16.mxu0 %vm569_vm1, %v2375_v22 }
  0xe5   : > { %783 = vrot.lane.b32.xlu1 %v2380_v23, %s2238_s28 }
  0xe7   : > { %781 = vrot.lane.b32.xlu0 %v2375_v22, %s2238_s28  ;;  %s2247_s28 = smov 40  }
 0x14b   : > { %v532_v24 = vpop.permute.xlu1 %531 }
 0x14d   : > { %v528_v25 = vpop.permute.xlu0 %527 }
 0x14e   : > { %536 = vxpose.xlu0.b32.start [1/3] (short) (narrow) %v528_v25, 8 }
 0x14f   : > { %v738_v26 = vpop.permute.xlu1 %737 }
 0x150   : > { %746 = vxpose.xlu1.b32.start [1/3] (short) (narrow) %v738_v26, 8 }
 0x151   : > { %v530_v27 = vpop.permute.xlu0 %529 }
 0x152   : > { %537 = vxpose.xlu0.b32.cont [2/3] (short) (narrow) %v530_v27, 8 }
 0x153   : > { %v742_v29 = vpop.permute.xlu1 %741 }
 0x155   : > { %v740_v28 = vpop.permute.xlu0 %739 }
 0x156   : > { %747 = vxpose.xlu1.b32.cont [2/3] (short) (narrow) %v740_v28, 8  ;;  %538 = vxpose.xlu0.b32.end [3/3] (short) (narrow) %v532_v24, 8  ;;  %v2421_v28 = vpack.c.bf16 %v2367_v18, %v2363_v15 }
 0x157   : > { %v784_v31 = vpop.permute.xlu1 %783 }
 0x159   : > { %v782_v30 = vpop.permute.xlu0 %781 }
 0x15a   : > { %748 = vxpose.xlu1.b32.end [3/3] (short) (narrow) %v742_v29, 8 }
 0x1ca   : > { %v552_v32 = vpop.trf.xlu0 }
 0x1cb   : > { %v568_v33 = vpack.c.bf16 %v552_v32, %v552_v32 }
 0x1cd   : > { %v578_v34 = vsel %vm576_vm2, %v568_v33, 0  ;;  %2133 = vmatprep.subr.msk.bf16.mxu0 %vm576_vm2, %v568_v33 }
 0x1ce   : > { %2034 = vmatpush3.bf16.msra.mxu0 %v578_v34  ;;  %v762_v35 = vpop.trf.xlu1 }
 0x1cf   : > { %v778_v36 = vpack.c.bf16 %v762_v35, %v762_v35 }
 0x1d1   : > { %2036 = vmatmul.mubr.msk.bf16.vlgmr.msra.gmra.mxu0 %vm569_vm1, %v2380_v23  ;;  %v792_v37 = vsel %vm576_vm2, %v778_v36, 0  ;;  %2134 = vmatprep.subr.msk.bf16.mxu0 %vm576_vm2, %v778_v36 }
 0x1d2   : > { %2049 = vmatprep.mubr.msk.bf16.mxu0 %vm569_vm1, %v782_v30  ;;  %2048 = vmatpush3.bf16.msra.mxu0 %v792_v37 }
 0x1d9   : > { %2050 = vmatmul.mubr.msk.bf16.vlgmr.msra.gmra.mxu0 %vm569_vm1, %v784_v31 }
 0x291   : > { %v2037_v38 = vpop.f32.mrf.mxu0 }
 0x292   : > { %v636_v43 = vsel %vm635_vm4, %v2037_v38, -inf }
 0x293   : > { %v614_v39 = vpop.f32.mrf.mxu0 }
 0x294   : > { %v629_v40 = vsel %vm628_vm3, %v614_v39, -inf }
 0x295   : > { %630 = vmax.xlane.f32.xlu0 %v629_v40  ;;  %v2038_v41 = vpop.f32.mrf.mxu0 }
 0x297   : > { %v617_v42 = vpop.f32.mrf.mxu0 }
 0x298   : > { %v632_v44 = vsel %vm628_vm3, %v617_v42, -inf }
 0x299   : > { %637 = vmax.xlane.f32.xlu0 %v636_v43  ;;  %v2051_v45 = vpop.f32.mrf.mxu0  ;;  %633 = vmax.xlane.f32.xlu1 %v632_v44 }
 0x29a   : > { %v848_v50 = vsel %vm635_vm4, %v2051_v45, -inf }
 0x29b   : > { %v828_v46 = vpop.f32.mrf.mxu0 }
 0x29c   : > { %v842_v47 = vsel %vm628_vm3, %v828_v46, -inf }
 0x29d   : > { %843 = vmax.xlane.f32.xlu0 %v842_v47  ;;  %v2052_v48 = vpop.f32.mrf.mxu0 }
 0x29f   : > { %v831_v49 = vpop.f32.mrf.mxu0 }
 0x2a0   : > { %v845_v51 = vsel %vm628_vm3, %v831_v49, -inf }
 0x2a1   : > { %849 = vmax.xlane.f32.xlu0 %v848_v50  ;;  %846 = vmax.xlane.f32.xlu1 %v845_v51 }
 0x2b2   : > { %671 = vrot.lane.b32.xlu1 %v2400_v52, %s2239_s29 }
 0x31e   : > { %v631_v53 = vpop.xlane.xlu0 %630 }
 0x31f   : > { %v639_v54 = vsub.f32 %v614_v39, %v631_v53 }
 0x321   : > { %v642_v59 = vmul.f32 1.442695, %v639_v54 }
 0x322   : > { %v638_v55 = vpop.xlane.xlu0 %637  ;;  %v634_v56 = vpop.xlane.xlu1 %633 }
 0x323   : > { %v641_v57 = vsub.f32 %v2037_v38, %v638_v55  ;;  %v640_v58 = vsub.f32 %v617_v42, %v634_v56 }
 0x325   : > { %v646_v60 = vmul.f32 1.442695, %v641_v57  ;;  %v644_v61 = vmul.f32 1.442695, %v640_v58 }
 0x326   : > { %v844_v62 = vpop.xlane.xlu0 %843 }
 0x327   : > { %2168 = vpow2.f32 %v646_v60  ;;  %v851_v63 = vsub.f32 %v828_v46, %v844_v62  ;;  %v518_v62 = vld [vmem:[%s2606_s3] sm:$0xff] }
 0x328   : > { %2170 = vpow2.f32 %v644_v61 }
 0x329   : > { %2172 = vpow2.f32 %v642_v59  ;;  %v854_v5 = vmul.f32 1.442695, %v851_v63  ;;  %v736_v63 = vpack.c.bf16 %v518_v62, %v518_v62 }
 0x32a   : > { %v850_v0 = vpop.xlane.xlu0 %849  ;;  %v847_v1 = vpop.xlane.xlu1 %846 }
 0x32b   : > { %v853_v2 = vsub.f32 %v2051_v45, %v850_v0  ;;  %v852_v27 = vsub.f32 %v831_v49, %v847_v1  ;;  %v1006_v0 = vsel %vm576_vm2, %v736_v63, 0  ;;  %v519_v1 = vld [vmem:[%s2606_s3 + $0x8] sm:$0xff] }
 0x32d   : > { %v858_v9 = vmul.f32 1.442695, %v853_v2  ;;  %v856_v29 = vmul.f32 1.442695, %v852_v27  ;;  %v941_v2 = vpack.c.bf16 %v519_v1, %v519_v1 }
 0x32e   : > { %v672_v10 = vpop.permute.xlu1 %671 }
 0x32f   : > { %2174 = vpow2.f32 %v858_v9  ;;  %v684_v11 = vand.u32 %v2404_v4, %v672_v10  ;;  %2135 = vmatprep.subr.msk.bf16.mxu0 %vm576_vm2, %v941_v2  ;;  %v949_v3 = vsel %vm576_vm2, %v941_v2, 0 }
 0x330   : > { %2176 = vpow2.f32 %v854_v5  ;;  %2062 = vmatpush3.bf16.msra.mxu0 %v949_v3 }
 0x331   : > { %2039 = vmatprep.subr.bf16.mxu1 %v684_v11  ;;  %2178 = vpow2.f32 %v856_v29 }
 0x332   : > { %2040 = vmatpush3.bf16.msra.mxu1 %v684_v11 }
 0x334   : > { %v2169_v12 = vpop.eup %2168 }
 0x335   : > { %v2171_v14 = vpop.eup %2170  ;;  %v654_v16 = vsel %vm635_vm4, %v2169_v12, 0.0 }
 0x336   : > { %v2173_v17 = vpop.eup %2172  ;;  %655 = vadd.xlane.f32.xlu1 %v654_v16  ;;  %v651_v19 = vsel %vm628_vm3, %v2171_v14, 0.0 }
 0x337   : > { %652 = vadd.xlane.f32.xlu0 %v651_v19  ;;  %v648_v20 = vsel %vm628_vm3, %v2173_v17, 0.0 }
 0x33a   : > { %649 = vadd.xlane.f32.xlu1 %v648_v20 }
 0x33c   : > { %v2410_v21 = vpop.eup %2174 }
 0x33d   : > { %v866_v24 = vsel %vm635_vm4, %v2410_v21, 0.0  ;;  %v2414_v25 = vpop.eup %2176 }
 0x33e   : > { %867 = vadd.xlane.f32.xlu0 %v866_v24  ;;  %v860_v26 = vsel %vm628_vm3, %v2414_v25, 0.0  ;;  %v2179_v30 = vpop.eup %2178 }
 0x33f   : > { %v863_v31 = vsel %vm628_vm3, %v2179_v30, 0.0 }
 0x342   : > { %861 = vadd.xlane.f32.xlu0 %v860_v26 }
 0x34b   : > { %879 = vrot.lane.b32.xlu1 %v2400_v52, %s2241_s30 }
 0x358   : > { %669 = vrot.lane.b32.xlu0 %v2421_v28, %s2239_s29  ;;  %s440_s29 = scalar_lea.vmem %s2616_s13, %s2141_s18 }
 0x35c   : > { %1056 = vrot.lane.b32.xlu0 %v2363_v15, %s2242_s14 }
 0x360   : > { %1060 = vrot.lane.b32.xlu0 %v2361_v13, %s2242_s14 }
 0x364   : > { %1100 = vrot.lane.b32.xlu0 %v2380_v23, %s2243_s15 }
 0x36f   : > { %864 = vadd.xlane.f32.xlu1 %v863_v31 }
 0x380   : > { %877 = vrot.lane.b32.xlu1 %v2421_v28, %s2241_s30 }
 0x384   : > { %1058 = vrot.lane.b32.xlu1 %v2367_v18, %s2242_s14 }
 0x388   : > { %1098 = vrot.lane.b32.xlu1 %v2375_v22, %s2243_s15 }
 0x3bf   : > { %v656_v32 = vpop.xlane.xlu1 %655 }
 0x3c0   : > { %v653_v33 = vpop.xlane.xlu0 %652  ;;  %2180 = vrcp.f32 %v656_v32 }
 0x3c1   : > { %2182 = vrcp.f32 %v653_v33 }
 0x3c3   : > { %v650_v34 = vpop.xlane.xlu1 %649 }
 0x3c4   : > { %2184 = vrcp.f32 %v650_v34 }
 0x3c7   : > { %v868_v35 = vpop.xlane.xlu0 %867  ;;  %v880_v37 = vpop.permute.xlu1 %879 }
 0x3c8   : > { %v889_v41 = vand.u32 %v880_v37, %v2404_v4  ;;  %2186 = vrcp.f32 %v868_v35 }
 0x3cb   : > { %v862_v36 = vpop.xlane.xlu0 %861 }
 0x3cc   : > { %2188 = vrcp.f32 %v862_v36 }
 0x3cd   : > { %v2181_v38 = vpop.eup %2180 }
 0x3ce   : > { %v2183_v39 = vpop.eup %2182  ;;  %v662_v43 = vmul.f32 %v2181_v38, %v2169_v12 }
 0x3cf   : > { %v670_v40 = vpop.permute.xlu0 %669  ;;  %v661_v45 = vmul.f32 %v2183_v39, %v2171_v14 }
 0x3d0   : > { %2041 = vmatprep.subr.bf16.mxu1 %v670_v40  ;;  %v664_v48 = vpack.c.bf16 %v662_v43, %v662_v43 }
 0x3d1   : > { %v2185_v42 = vpop.eup %2184  ;;  %2042 = vmatpush3.bf16.msra.mxu1 %v670_v40 }
 0x3d2   : > { %2053 = vmatprep.subr.bf16.mxu1 %v889_v41  ;;  %v660_v44 = vmul.f32 %v2185_v42, %v2173_v17 }
 0x3d3   : > { %v1057_v46 = vpop.permute.xlu0 %1056 }
 0x3d4   : > { %1065 = vxpose.xlu1.b32.start [1/3] (short) (narrow) %v1057_v46, 8  ;;  %v663_v47 = vpack.c.bf16 %v661_v45, %v660_v44  ;;  %v2163_v46 = vpack.i.bf16 %v2367_v18, %v2363_v15 }
 0x3d5   : > { %v2187_v53 = vpop.eup %2186 }
 0x3d6   : > { %2043 = vmatprep.mubr.msk.bf16.mxu1 %vm628_vm3, %v663_v47  ;;  %v874_v57 = vmul.f32 %v2187_v53, %v2410_v21 }
 0x3d7   : > { %2044 = vmatmul.mubr.msk.bf16.vlgmr.msra.gmra.mxu1 %vm628_vm3, %v664_v48  ;;  %v1061_v55 = vpop.permute.xlu0 %1060 }
 0x3d8   : > { %2054 = vmatpush3.bf16.msra.mxu1 %v889_v41  ;;  %v876_v61 = vpack.c.bf16 %v874_v57, %v874_v57 }
 0x3d9   : > { %v2189_v54 = vpop.eup %2188 }
 0x3da   : > { %v872_v58 = vmul.f32 %v2189_v54, %v2414_v25 }
 0x3db   : > { %v1101_v29 = vpop.permute.xlu0 %1100 }
 0x3f8   : > { %v865_v49 = vpop.xlane.xlu1 %864 }
 0x3f9   : > { %2190 = vrcp.f32 %v865_v49 }
 0x3fc   : > { %v878_v50 = vpop.permute.xlu1 %877 }
 0x3fd   : > { %2055 = vmatprep.subr.bf16.mxu1 %v878_v50 }
 0x3fe   : > { %2056 = vmatpush3.bf16.msra.mxu1 %v878_v50 }
 0x3ff   : > { %2136 = vmatprep.subr.msk.bf16.mxu1 %vm576_vm2, %v736_v63 }
 0x400   : > { %v1059_v51 = vpop.permute.xlu1 %1058 }
 0x401   : > { %1066 = vxpose.xlu1.b32.cont [2/3] (short) (narrow) %v1059_v51, 8 }
 0x404   : > { %v1099_v5 = vpop.permute.xlu1 %1098 }
 0x405   : > { %1067 = vxpose.xlu1.b32.end [3/3] (short) (narrow) %v1061_v55, 8 }
 0x406   : > { %v2191_v56 = vpop.eup %2190 }
 0x407   : > { %v873_v59 = vmul.f32 %v2191_v56, %v2179_v30 }
 0x409   : > { %v875_v60 = vpack.c.bf16 %v873_v59, %v872_v58 }
 0x40b   : > { %2057 = vmatprep.mubr.msk.bf16.mxu1 %vm628_vm3, %v875_v60 }
 0x40c   : > { %2058 = vmatmul.mubr.msk.bf16.vlgmr.msra.gmra.mxu1 %vm628_vm3, %v876_v61 }
 0x40d   : > { %2068 = vmatpush3.bf16.msra.mxu1 %v1006_v0 }
 0x423   : > { %1323 = vrot.lane.b32.xlu1 %v2361_v13, %s2244_s19 }
 0x479   : > { %v1081_v9 = vpop.trf.xlu1 }
 0x47a   : > { %v1097_v10 = vpack.c.bf16 %v1081_v9, %v1081_v9 }
 0x47c   : > { %2137 = vmatprep.subr.msk.bf16.mxu0 %vm576_vm2, %v1097_v10  ;;  %v1109_v26 = vsel %vm576_vm2, %v1097_v10, 0 }
 0x495   : > { %v1324_v0 = vpop.permute.xlu1 %1323 }
 0x497   : > { %v2045_v11 = vpop.f32.mrf.mxu1 }
 0x498   : > { %v735_v17 = vpack.c.bf16 %v2045_v11, %v2045_v11 }
 0x499   : > { %v720_v12 = vpop.f32.mrf.mxu1 }
 0x49b   : > { %v2046_v14 = vpop.f32.mrf.mxu1 }
 0x49d   : > { %v723_v16 = vpop.f32.mrf.mxu1 }
 0x49e   : > { %v734_v13 = vpack.c.bf16 %v723_v16, %v720_v12 }
 0x4a0   : > { %2069 = vmatprep.mubr.msk.bf16.mxu1 %vm569_vm1, %v734_v13 }
 0x4a1   : > { %2070 = vmatmul.mubr.msk.bf16.vlgmr.msra.gmra.mxu1 %vm569_vm1, %v735_v17 }
 0x4cc   : > { %v2059_v19 = vpop.f32.mrf.mxu1 }
 0x4cd   : > { %v940_v27 = vpack.c.bf16 %v2059_v19, %v2059_v19 }
 0x4ce   : > { %v925_v20 = vpop.f32.mrf.mxu1 }
 0x4d0   : > { %v2060_v21 = vpop.f32.mrf.mxu1 }
 0x4d2   : > { %v928_v24 = vpop.f32.mrf.mxu1 }
 0x4d3   : > { %v939_v25 = vpack.c.bf16 %v928_v24, %v925_v20 }
 0x4d5   : > { %2063 = vmatprep.mubr.msk.bf16.mxu0 %vm569_vm1, %v939_v25 }
 0x4d6   : > { %2064 = vmatmul.mubr.msk.bf16.vlgmr.msra.gmra.mxu0 %vm569_vm1, %v940_v27 }
 0x4d7   : > { %2075 = vmatprep.mubr.msk.bf16.mxu0 %vm569_vm1, %v1099_v5  ;;  %2074 = vmatpush3.bf16.msra.mxu0 %v1109_v26  ;;  %v520_v26 = vld [vmem:[%s2606_s3 + $0x10] sm:$0xff] }
 0x4d8   : > { %v1258_v27 = vpack.c.bf16 %v520_v26, %v520_v26 }
 0x4da   : > { %2138 = vmatprep.subr.msk.bf16.mxu0 %vm576_vm2, %v1258_v27 }
 0x4de   : > { %2076 = vmatmul.mubr.msk.bf16.vlgmr.msra.gmra.mxu0 %vm569_vm1, %v1101_v29  ;;  %v1266_v29 = vsel %vm576_vm2, %v1258_v27, 0 }
 0x4df   : > { %2088 = vmatpush3.bf16.msra.mxu0 %v1266_v29 }
 0x561   : > { %v2071_v30 = vpop.f32.mrf.mxu1 }
 0x563   : > { %v1042_v31 = vpop.f32.mrf.mxu1 }
 0x565   : > { %v2072_v32 = vpop.f32.mrf.mxu1 }
 0x596   : > { %v2065_v33 = vpop.f32.mrf.mxu0 }
 0x597   : > { %v2459_v34 = vadd.f32 %v2071_v30, %v2065_v33  ;;  %v2490_v30 = vpop.f32.mrf.mxu1 }
 0x598   : > { %v985_v35 = vpop.f32.mrf.mxu0 }
 0x599   : > { %v2461_v36 = vadd.f32 %v1042_v31, %v985_v35 }
 0x59a   : > { %v2066_v37 = vpop.f32.mrf.mxu0 }
 0x59c   : > { %v2463_v38 = vpop.f32.mrf.mxu0 }
 0x59e   : > { %v2077_v39 = vpop.f32.mrf.mxu0 }
 0x59f   : > { %v1165_v45 = vsel %vm635_vm4, %v2077_v39, -inf }
 0x5a0   : > { %v1145_v40 = vpop.f32.mrf.mxu0 }
 0x5a1   : > { %v1159_v41 = vsel %vm628_vm3, %v1145_v40, -inf }
 0x5a2   : > { %1160 = vmax.xlane.f32.xlu0 %v1159_v41  ;;  %v2078_v42 = vpop.f32.mrf.mxu0 }
 0x5a4   : > { %v1148_v43 = vpop.f32.mrf.mxu0 }
 0x5a5   : > { %v1162_v44 = vsel %vm628_vm3, %v1148_v43, -inf }
 0x5a6   : > { %1163 = vmax.xlane.f32.xlu0 %v1162_v44 }
 0x5aa   : > { %1166 = vmax.xlane.f32.xlu0 %v1165_v45 }
 0x5c0   : > { %2164 = vrot.lane.b32.xlu0 %v2163_v46, %s2244_s19 }
 0x62b   : > { %v1161_v47 = vpop.xlane.xlu0 %1160 }
 0x62c   : > { %v1168_v48 = vsub.f32 %v1145_v40, %v1161_v47 }
 0x62e   : > { %v1171_v49 = vmul.f32 1.442695, %v1168_v48 }
 0x62f   : > { %v1164_v50 = vpop.xlane.xlu0 %1163 }
 0x630   : > { %2192 = vpow2.f32 %v1171_v49  ;;  %v1169_v51 = vsub.f32 %v1148_v43, %v1164_v50 }
 0x632   : > { %v1173_v55 = vmul.f32 1.442695, %v1169_v51 }
 0x633   : > { %v1167_v53 = vpop.xlane.xlu0 %1166 }
 0x634   : > { %v1170_v54 = vsub.f32 %v2077_v39, %v1167_v53 }
 0x636   : > { %v1175_v56 = vmul.f32 1.442695, %v1170_v54 }
 0x637   : > { %v2165_v61 = vpop.permute.xlu0 %2164 }
 0x638   : > { %2194 = vpow2.f32 %v1175_v56  ;;  %v2166_v62 = vunpack.i.l.bf16 %v2165_v61  ;;  %v2167_v63 = vunpack.i.h.bf16 %v2165_v61 }
 0x639   : > { %2196 = vpow2.f32 %v1173_v55 }
 0x63d   : > { %v2193_v57 = vpop.eup %2192 }
 0x63e   : > { %v1177_v58 = vsel %vm628_vm3, %v2193_v57, 0.0 }
 0x63f   : > { %1178 = vadd.xlane.f32.xlu1 %v1177_v58 }
 0x645   : > { %v2195_v59 = vpop.eup %2194 }
 0x646   : > { %v1183_v15 = vsel %vm635_vm4, %v2195_v59, 0.0  ;;  %v2197_v18 = vpop.eup %2196 }
 0x647   : > { %1184 = vadd.xlane.f32.xlu0 %v1183_v15  ;;  %v1180_v60 = vsel %vm628_vm3, %v2197_v18, 0.0 }
 0x64b   : > { %1181 = vadd.xlane.f32.xlu0 %v1180_v60 }
 0x650   : > { %1194 = vrot.lane.b32.xlu1 %v2421_v28, %s2245_s22 }
 0x654   : > { %1361 = vrot.lane.b32.xlu1 %v2375_v22, %s2246_s23 }
 0x658   : > { %1363 = vrot.lane.b32.xlu1 %v2380_v23, %s2246_s23 }
 0x661   : > { %1196 = vrot.lane.b32.xlu0 %v2400_v52, %s2245_s22 }
 0x681   : > { %1328 = vxpose.xlu1.b32.start [1/3] (short) (narrow) %v2166_v62, 8 }
 0x685   : > { %1329 = vxpose.xlu1.b32.cont [2/3] (short) (narrow) %v2167_v63, 8 }
 0x689   : > { %1330 = vxpose.xlu1.b32.end [3/3] (short) (narrow) %v1324_v0, 8 }
 0x6c8   : > { %v1179_v1 = vpop.xlane.xlu1 %1178 }
 0x6cc   : > { %v1195_v23 = vpop.permute.xlu1 %1194 }
 0x6d0   : > { %v1185_v2 = vpop.xlane.xlu0 %1184  ;;  %v1362_v19 = vpop.permute.xlu1 %1361 }
 0x6d1   : > { %2198 = vrcp.f32 %v1185_v2 }
 0x6d2   : > { %2200 = vrcp.f32 %v1179_v1 }
 0x6d4   : > { %v1182_v3 = vpop.xlane.xlu0 %1181  ;;  %v1364_v20 = vpop.permute.xlu1 %1363 }
 0x6d5   : > { %2202 = vrcp.f32 %v1182_v3 }
 0x6d8   : > { %v1197_v5 = vpop.permute.xlu0 %1196 }
 0x6d9   : > { %v1206_v22 = vand.u32 %v1197_v5, %v2404_v4 }
 0x6db   : > { %2079 = vmatprep.subr.bf16.mxu1 %v1206_v22 }
 0x6dc   : > { %2080 = vmatpush3.bf16.msra.mxu1 %v1206_v22 }
 0x6dd   : > { %2081 = vmatprep.subr.bf16.mxu1 %v1195_v23 }
 0x6de   : > { %v2199_v9 = vpop.eup %2198 }
 0x6df   : > { %v2201_v10 = vpop.eup %2200  ;;  %v1191_v12 = vmul.f32 %v2199_v9, %v2195_v59 }
 0x6e0   : > { %2082 = vmatpush3.bf16.msra.mxu1 %v1195_v23  ;;  %v1189_v14 = vmul.f32 %v2201_v10, %v2193_v57 }
 0x6e1   : > { %v1193_v17 = vpack.c.bf16 %v1191_v12, %v1191_v12 }
 0x6e2   : > { %v2203_v11 = vpop.eup %2202 }
 0x6e3   : > { %v1190_v16 = vmul.f32 %v2203_v11, %v2197_v18 }
 0x6e5   : > { %v1192_v13 = vpack.c.bf16 %v1190_v16, %v1189_v14 }
 0x6e7   : > { %2083 = vmatprep.mubr.msk.bf16.mxu1 %vm628_vm3, %v1192_v13 }
 0x6e8   : > { %2084 = vmatmul.mubr.msk.bf16.vlgmr.msra.gmra.mxu1 %vm628_vm3, %v1193_v17 }
 0x6e9   : > { %2095 = vmatprep.mubr.msk.bf16.mxu1 %vm569_vm1, %v1362_v19 }
 0x6fd   : > { %v1344_v21 = vpop.trf.xlu1 }
 0x6fe   : > { %v1360_v24 = vpack.c.bf16 %v1344_v21, %v1344_v21 }
 0x700   : > { %v1372_v25 = vsel %vm576_vm2, %v1360_v24, 0  ;;  %2139 = vmatprep.subr.msk.bf16.mxu1 %vm576_vm2, %v1360_v24 }
 0x701   : > { %2094 = vmatpush3.bf16.msra.mxu1 %v1372_v25 }
 0x704   : > { %2096 = vmatmul.mubr.msk.bf16.vlgmr.msra.gmra.mxu1 %vm569_vm1, %v1364_v20 }
 0x7a8   : > { %v2085_v31 = vpop.f32.mrf.mxu1 }
 0x7a9   : > { %v1257_v39 = vpack.c.bf16 %v2085_v31, %v2085_v31  ;;  %v1046_v31 = vadd.f32 %v2490_v30, %v2463_v38 }
 0x7aa   : > { %v1242_v32 = vpop.f32.mrf.mxu1 }
 0x7ac   : > { %v2086_v33 = vpop.f32.mrf.mxu1 }
 0x7ad   : > { %v1958_v33 = vld [vmem:[%s2607_s4] ss:$0 sm:$0xff] }
 0x7ae   : > { %v1245_v35 = vpop.f32.mrf.mxu1 }
 0x7af   : > { %v1256_v37 = vpack.c.bf16 %v1245_v35, %v1242_v32 }
 0x7b1   : > { %2089 = vmatprep.mubr.msk.bf16.mxu0 %vm569_vm1, %v1256_v37 }
 0x7b2   : > { %2090 = vmatmul.mubr.msk.bf16.vlgmr.msra.gmra.mxu0 %vm569_vm1, %v1257_v39 }
 0x7c4   : > { %v2097_v40 = vpop.f32.mrf.mxu1 }
 0x7c5   : > { %v1428_v46 = vsel %vm635_vm4, %v2097_v40, -inf }
 0x7c6   : > { %v1408_v41 = vpop.f32.mrf.mxu1 }
 0x7c7   : > { %v1422_v42 = vsel %vm628_vm3, %v1408_v41, -inf }
 0x7c8   : > { %1423 = vmax.xlane.f32.xlu0 %v1422_v42  ;;  %v2098_v43 = vpop.f32.mrf.mxu1 }
 0x7ca   : > { %v1411_v44 = vpop.f32.mrf.mxu1 }
 0x7cb   : > { %v1425_v45 = vsel %vm628_vm3, %v1411_v44, -inf }
 0x7cc   : > { %1426 = vmax.xlane.f32.xlu0 %v1425_v45 }
 0x7d0   : > { %1429 = vmax.xlane.f32.xlu0 %v1428_v46 }
 0x7e6   : > { %1459 = vrot.lane.b32.xlu0 %v2400_v52, %s2247_s28 }
 0x851   : > { %v1424_v47 = vpop.xlane.xlu0 %1423 }
 0x852   : > { %v1431_v48 = vsub.f32 %v1408_v41, %v1424_v47 }
 0x854   : > { %v1434_v49 = vmul.f32 1.442695, %v1431_v48 }
 0x855   : > { %v1427_v50 = vpop.xlane.xlu0 %1426 }
 0x856   : > { %2204 = vpow2.f32 %v1434_v49  ;;  %v1432_v51 = vsub.f32 %v1411_v44, %v1427_v50 }
 0x858   : > { %v1436_v53 = vmul.f32 1.442695, %v1432_v51 }
 0x859   : > { %v1430_v54 = vpop.xlane.xlu0 %1429 }
 0x85a   : > { %2206 = vpow2.f32 %v1436_v53  ;;  %v1433_v55 = vsub.f32 %v2097_v40, %v1430_v54 }
 0x85c   : > { %v1438_v56 = vmul.f32 1.442695, %v1433_v55 }
 0x85d   : > { %v1460_v57 = vpop.permute.xlu0 %1459 }
 0x85e   : > { %2208 = vpow2.f32 %v1438_v56  ;;  %v1469_v58 = vand.u32 %v1460_v57, %v2404_v4 }
 0x860   : > { %2099 = vmatprep.subr.bf16.mxu0 %v1469_v58 }
 0x861   : > { %2100 = vmatpush3.bf16.msra.mxu0 %v1469_v58 }
 0x863   : > { %v2205_v59 = vpop.eup %2204 }
 0x864   : > { %v1440_v52 = vsel %vm628_vm3, %v2205_v59, 0.0 }
 0x865   : > { %1441 = vadd.xlane.f32.xlu0 %v1440_v52 }
 0x867   : > { %v2207_v15 = vpop.eup %2206 }
 0x868   : > { %v1443_v18 = vsel %vm628_vm3, %v2207_v15, 0.0 }
 0x869   : > { %1444 = vadd.xlane.f32.xlu0 %v1443_v18  ;;  %v1658_v18 = vld [vmem:[%s2610_s7 + $0x10] sm:$0xff] }
 0x86b   : > { %v2209_v60 = vpop.eup %2208 }
 0x86c   : > { %v1446_v61 = vsel %vm635_vm4, %v2209_v60, 0.0 }
 0x86d   : > { %1447 = vadd.xlane.f32.xlu1 %v1446_v61 }
 0x872   : > { %v2091_v62 = vpop.f32.mrf.mxu0 }
 0x873   : > { %v1318_v63 = vadd.f32 %v2091_v62, %v2459_v34  ;;  %v1656_v62 = vld [vmem:[%s2610_s7] sm:$0xff] }
 0x874   : > { %v1302_v0 = vpop.f32.mrf.mxu0 }
 0x875   : > { %v1316_v4 = vadd.f32 %v1302_v0, %v2461_v36 }
 0x876   : > { %v2092_v1 = vpop.f32.mrf.mxu0 }
 0x877   : > { %v1735_v1 = vld [vmem:[%s2612_s9 + $0x38] sm:$0xff] }
 0x878   : > { %v1305_v17 = vpop.f32.mrf.mxu0 }
 0x879   : > { %v1317_v37 = vadd.f32 %v1305_v17, %v1046_v31 }
 0x87f   : > { %1457 = vrot.lane.b32.xlu0 %v2421_v28, %s2247_s28  ;;  %v521_v28 = vld [vmem:[%s2606_s3 + $0x18] sm:$0xff] }
 0x880   : > { %v1521_v16 = vpack.c.bf16 %v521_v28, %v521_v28  ;;  %v1959_v28 = vld [vmem:[%s2608_s5] ss:$0 sm:$0xff] }
 0x882   : > { %2140 = vmatprep.subr.msk.bf16.mxu1 %vm576_vm2, %v1521_v16  ;;  %v1529_v13 = vsel %vm576_vm2, %v1521_v16, 0 }
 0x883   : > { %2108 = vmatpush3.bf16.msra.mxu1 %v1529_v13 }
 0x8ee   : > { %v1442_v2 = vpop.xlane.xlu0 %1441 }
 0x8ef   : > { %2210 = vrcp.f32 %v1442_v2 }
 0x8f2   : > { %v1445_v3 = vpop.xlane.xlu0 %1444 }
 0x8f3   : > { %2212 = vrcp.f32 %v1445_v3 }
 0x8f6   : > { %v1448_v5 = vpop.xlane.xlu1 %1447  ;;  %v1458_v22 = vpop.permute.xlu0 %1457 }
 0x8f7   : > { %2214 = vrcp.f32 %v1448_v5  ;;  %2101 = vmatprep.subr.bf16.mxu0 %v1458_v22 }
 0x8f8   : > { %2102 = vmatpush3.bf16.msra.mxu0 %v1458_v22 }
 0x8fc   : > { %v2211_v23 = vpop.eup %2210 }
 0x8fd   : > { %v1452_v10 = vmul.f32 %v2211_v23, %v2205_v59 }
 0x900   : > { %v2213_v9 = vpop.eup %2212 }
 0x901   : > { %v1453_v34 = vmul.f32 %v2213_v9, %v2207_v15 }
 0x903   : > { %v1455_v11 = vpack.c.bf16 %v1453_v34, %v1452_v10 }
 0x904   : > { %v2215_v12 = vpop.eup %2214 }
 0x905   : > { %2103 = vmatprep.mubr.msk.bf16.mxu0 %vm628_vm3, %v1455_v11  ;;  %v1454_v36 = vmul.f32 %v2215_v12, %v2209_v60  ;;  %v1659_v60 = vld [vmem:[%s2610_s7 + $0x18] sm:$0xff] }
 0x906   : > { %v1663_v61 = vpack.c.bf16 %v1659_v60, %v1658_v18 }
 0x907   : > { %v1456_v14 = vpack.c.bf16 %v1454_v36, %v1454_v36 }
 0x908   : > { %2113 = vmatprep.subr.bf16.mxu0 %v1663_v61 }
 0x909   : > { %2104 = vmatmul.mubr.msk.bf16.vlgmr.msra.gmra.mxu0 %vm628_vm3, %v1456_v14 }
 0x90a   : > { %2114 = vmatpush3.bf16.msra.mxu0 %v1663_v61 }
 0x9c9   : > { %v2105_v19 = vpop.f32.mrf.mxu0 }
 0x9ca   : > { %v1520_v26 = vpack.c.bf16 %v2105_v19, %v2105_v19  ;;  %v1960_v19 = vld [vmem:[%s2609_s6] ss:$0 sm:$0xff] }
 0x9cb   : > { %v1505_v20 = vpop.f32.mrf.mxu0 }
 0x9cd   : > { %v2106_v21 = vpop.f32.mrf.mxu0 }
 0x9cf   : > { %v1508_v24 = vpop.f32.mrf.mxu0 }
 0x9d0   : > { %v1519_v25 = vpack.c.bf16 %v1508_v24, %v1505_v20 }
 0x9d2   : > { %2109 = vmatprep.mubr.msk.bf16.mxu1 %vm569_vm1, %v1519_v25 }
 0x9d3   : > { %2110 = vmatmul.mubr.msk.bf16.vlgmr.msra.gmra.mxu1 %vm569_vm1, %v1520_v26 }
 0xa93   : > { %v2111_v27 = vpop.f32.mrf.mxu1 }
 0xa94   : > { %v1581_v39 = vadd.f32 %v2111_v27, %v1318_v63  ;;  %v1657_v63 = vld [vmem:[%s2610_s7 + $0x8] sm:$0xff] }
 0xa95   : > { %v1565_v29 = vpop.f32.mrf.mxu1  ;;  %v1662_v0 = vpack.c.bf16 %v1657_v63, %v1656_v62 }
 0xa96   : > { %v1579_v32 = vadd.f32 %v1565_v29, %v1316_v4  ;;  %v1591_v44 = vadd.f32 %v1958_v33, %v1581_v39  ;;  %v1734_v4 = vld [vmem:[%s2612_s9 + $0x30] sm:$0xff] }
 0xa97   : > { %v2112_v35 = vpop.f32.mrf.mxu1  ;;  %2115 = vmatprep.subr.bf16.mxu0 %v1662_v0  ;;  %v1741_v2 = vpack.c.bf16 %v1735_v1, %v1734_v4  ;;  %v1730_v39 = vld [vmem:[%s2612_s9 + $0x10] sm:$0xff] }
 0xa98   : > { %v1589_v40 = vadd.f32 %v1958_v33, %v1579_v32  ;;  %v1594_v47 = vadd.f32 %v1591_v44, %v2350_v8  ;;  %2116 = vmatpush3.bf16.msra.mxu0 %v1662_v0  ;;  %v1733_v35 = vld [vmem:[%s2612_s9 + $0x28] sm:$0xff] }
 0xa99   : > { %v1568_v41 = vpop.f32.mrf.mxu1  ;;  %2121 = vmatprep.subr.bf16.mxu1 %v1741_v2 }
 0xa9a   : > { %v1580_v42 = vadd.f32 %v1568_v41, %v1317_v37  ;;  %v1592_v43 = vadd.f32 %v1589_v40, %v2346_v6  ;;  %v1604_v48 = vsel %vm1603_vm6, %v1594_v47, 0.0  ;;  %2122 = vmatpush3.bf16.msra.mxu1 %v1741_v2  ;;  %v1731_v40 = vld [vmem:[%s2612_s9 + $0x18] sm:$0xff] }
 0xa9b   : > { %v1739_v41 = vpack.c.bf16 %v1731_v40, %v1730_v39 }
 0xa9c   : > { %v1590_v45 = vadd.f32 %v1958_v33, %v1580_v42  ;;  %v1597_v46 = vsel %vm460_vm0, %v1592_v43, 0.0  ;;  %v1732_v33 = vld [vmem:[%s2612_s9 + $0x20] sm:$0xff] }
 0xa9d   : > { %1598 = vadd.xlane.f32.xlu0 %v1597_v46  ;;  %v1740_v37 = vpack.c.bf16 %v1733_v35, %v1732_v33  ;;  %v1728_v42 = vld [vmem:[%s2612_s9] sm:$0xff] }
 0xa9e   : > { %v1593_v38 = vadd.f32 %v1590_v45, %v2348_v7  ;;  %v1961_v46 = vld [vmem:[%s2611_s8] ss:$0 sm:$0xff] }
 0xa9f   : > { %2123 = vmatprep.subr.bf16.mxu1 %v1740_v37 }
 0xaa0   : > { %v1600_v30 = vsel %vm460_vm0, %v1593_v38, 0.0  ;;  %2124 = vmatpush3.bf16.msra.mxu1 %v1740_v37 }
 0xaa1   : > { %1601 = vadd.xlane.f32.xlu1 %v1600_v30  ;;  %2125 = vmatprep.subr.bf16.mxu1 %v1739_v41 }
 0xaa4   : > { %2126 = vmatpush3.bf16.msra.mxu1 %v1739_v41 }
 0xaa5   : > { %1605 = vadd.xlane.f32.xlu1 %v1604_v48 }
 0xb26   : > { %v1599_v49 = vpop.xlane.xlu0 %1598 }
 0xb27   : > { %v1608_v50 = vmul.f32 0.03125, %v1599_v49 }
 0xb29   : > { %v1611_v51 = vsub.f32 %v1592_v43, %v1608_v50  ;;  %v1729_v43 = vld [vmem:[%s2612_s9 + $0x8] sm:$0xff] }
 0xb2a   : > { %v1602_v6 = vpop.xlane.xlu1 %1601  ;;  %v1738_v44 = vpack.c.bf16 %v1729_v43, %v1728_v42 }
 0xb2b   : > { %v1609_v53 = vmul.f32 0.03125, %v1602_v6  ;;  %v1614_v54 = vmul.f32 %v1611_v51, %v1611_v51 }
 0xb2c   : > { %2127 = vmatprep.subr.bf16.mxu1 %v1738_v44 }
 0xb2d   : > { %v1612_v55 = vsub.f32 %v1593_v38, %v1609_v53  ;;  %v1617_v56 = vsel %vm460_vm0, %v1614_v54, 0.0  ;;  %2128 = vmatpush3.bf16.msra.mxu1 %v1738_v44 }
 0xb2e   : > { %1618 = vadd.xlane.f32.xlu1 %v1617_v56  ;;  %v1606_v7 = vpop.xlane.xlu1 %1605 }
 0xb2f   : > { %v1610_v57 = vmul.f32 0.03125, %v1606_v7  ;;  %v1615_v58 = vmul.f32 %v1612_v55, %v1612_v55  ;;  %v1964_v7 = vld [vmem:[%s2613_s10] ss:$0 sm:$0xff] }
 0xb31   : > { %v1613_v59 = vsub.f32 %v1594_v47, %v1610_v57  ;;  %v1620_v8 = vsel %vm460_vm0, %v1615_v58, 0.0 }
 0xb32   : > { %1621 = vadd.xlane.f32.xlu1 %v1620_v8 }
 0xb33   : > { %v1616_v52 = vmul.f32 %v1613_v59, %v1613_v59 }
 0xb35   : > { %v1623_v15 = vsel %vm1603_vm6, %v1616_v52, 0.0 }
 0xb36   : > { %1624 = vadd.xlane.f32.xlu1 %v1623_v15 }
 0xbb7   : > { %v1619_v3 = vpop.xlane.xlu1 %1618 }
 0xbb8   : > { %v1626_v5 = vmul.f32 0.03125, %v1619_v3 }
 0xbba   : > { %v1629_v22 = vadd.f32 1e-05, %v1626_v5 }
 0xbbb   : > { %v1622_v23 = vpop.xlane.xlu1 %1621 }
 0xbbc   : > { %2216 = vrsqrt.f32 %v1629_v22  ;;  %v1627_v9 = vmul.f32 0.03125, %v1622_v23 }
 0xbbe   : > { %v1630_v10 = vadd.f32 1e-05, %v1627_v9 }
 0xbbf   : > { %v1625_v34 = vpop.xlane.xlu1 %1624 }
 0xbc0   : > { %2218 = vrsqrt.f32 %v1630_v10  ;;  %v1628_v11 = vmul.f32 0.03125, %v1625_v34 }
 0xbc2   : > { %v1631_v12 = vadd.f32 1e-05, %v1628_v11 }
 0xbc4   : > { %2220 = vrsqrt.f32 %v1631_v12 }
 0xbc9   : > { %v2217_v36 = vpop.eup %2216 }
 0xbca   : > { %v1635_v14 = vmul.f32 %v2217_v36, %v1611_v51 }
 0xbcc   : > { %v1644_v17 = vmul.f32 %v1959_v28, %v1635_v14 }
 0xbcd   : > { %v2219_v16 = vpop.eup %2218 }
 0xbce   : > { %v1636_v13 = vmul.f32 %v2219_v16, %v1612_v55  ;;  %v1653_v25 = vadd.f32 %v1960_v19, %v1644_v17 }
 0xbd0   : > { %v1645_v20 = vmul.f32 %v1959_v28, %v1636_v13 }
 0xbd1   : > { %v2221_v21 = vpop.eup %2220 }
 0xbd2   : > { %v1637_v24 = vmul.f32 %v2221_v21, %v1613_v59  ;;  %v1654_v26 = vadd.f32 %v1960_v19, %v1645_v20 }
 0xbd4   : > { %v1660_v27 = vpack.c.bf16 %v1654_v26, %v1653_v25  ;;  %v1646_v29 = vmul.f32 %v1959_v28, %v1637_v24 }
 0xbd6   : > { %2117 = vmatprep.mubr.msk.bf16.mxu0 %vm460_vm0, %v1660_v27  ;;  %v1655_v31 = vadd.f32 %v1960_v19, %v1646_v29  ;;  %v1967_v29 = vld [vmem:[%s2614_s11] ss:$0 sm:$0xff] }
 0xbd8   : > { %v1661_v32 = vpack.c.bf16 %v1655_v31, %v1655_v31 }
 0xbda   : > { %2118 = vmatmul.mubr.msk.bf16.vlgmr.msra.gmra.mxu0 %vm460_vm0, %v1661_v32  ;;  %v1968_v32 = vld [vmem:[%s2615_s12] ss:$0 sm:$0xff] }
 0xc9a   : > { %v2119_v45 = vpop.f32.mrf.mxu0 }
 0xc9b   : > { %v1720_v30 = vadd.f32 %v2119_v45, %v1961_v46 }
 0xc9c   : > { %v1711_v38 = vpop.f32.mrf.mxu0 }
 0xc9d   : > { %v1712_v48 = vadd.f32 %v1961_v46, %v1711_v38  ;;  %v1727_v51 = vmax.f32 %v1720_v30, 0.0 }
 0xc9e   : > { %v2120_v47 = vpop.f32.mrf.mxu0 }
 0xc9f   : > { %v1725_v6 = vmax.f32 %v1712_v48, 0.0  ;;  %v1737_v55 = vpack.c.bf16 %v1727_v51, %v1727_v51 }
 0xca0   : > { %v1714_v49 = vpop.f32.mrf.mxu0 }
 0xca1   : > { %v1715_v50 = vadd.f32 %v1961_v46, %v1714_v49 }
 0xca3   : > { %v1726_v53 = vmax.f32 %v1715_v50, 0.0 }
 0xca5   : > { %v1736_v54 = vpack.c.bf16 %v1726_v53, %v1725_v6 }
 0xca7   : > { %2129 = vmatprep.mubr.msk.bf16.mxu1 %vm1749_vm7, %v1736_v54 }
 0xca8   : > { %2130 = vmatmul.mubr.msk.bf16.vlgmr.msra.gmra.mxu1 %vm1749_vm7, %v1737_v55 }
 0xd68   : > { %v2131_v56 = vpop.f32.mrf.mxu1 }
 0xd69   : > { %v1799_v58 = vadd.f32 %v2131_v56, %v1964_v7 }
 0xd6a   : > { %v1790_v57 = vpop.f32.mrf.mxu1 }
 0xd6b   : > { %v1791_v59 = vadd.f32 %v1964_v7, %v1790_v57  ;;  %v1806_v61 = vadd.f32 %v1799_v58, %v1655_v31 }
 0xd6c   : > { %v2132_v8 = vpop.f32.mrf.mxu1 }
 0xd6d   : > { %v1804_v52 = vadd.f32 %v1791_v59, %v1653_v25  ;;  %v1815_v0 = vsel %vm1603_vm6, %v1806_v61, 0.0 }
 0xd6e   : > { %v1793_v15 = vpop.f32.mrf.mxu1 }
 0xd6f   : > { %v1794_v18 = vadd.f32 %v1964_v7, %v1793_v15  ;;  %v1809_v60 = vsel %vm460_vm0, %v1804_v52, 0.0 }
 0xd70   : > { %1810 = vadd.xlane.f32.xlu1 %v1809_v60 }
 0xd71   : > { %v1805_v62 = vadd.f32 %v1794_v18, %v1654_v26 }
 0xd73   : > { %v1812_v63 = vsel %vm460_vm0, %v1805_v62, 0.0 }
 0xd74   : > { %1813 = vadd.xlane.f32.xlu0 %v1812_v63  ;;  %1816 = vadd.xlane.f32.xlu1 %v1815_v0 }
 0xdf9   : > { %v1811_v4 = vpop.xlane.xlu1 %1810 }
 0xdfa   : > { %v1818_v1 = vmul.f32 0.03125, %v1811_v4 }
 0xdfc   : > { %v1821_v2 = vsub.f32 %v1804_v52, %v1818_v1 }
 0xdfd   : > { %v1814_v3 = vpop.xlane.xlu0 %1813  ;;  %v1817_v5 = vpop.xlane.xlu1 %1816 }
 0xdfe   : > { %v1819_v22 = vmul.f32 0.03125, %v1814_v3  ;;  %v1820_v23 = vmul.f32 0.03125, %v1817_v5  ;;  %v1824_v9 = vmul.f32 %v1821_v2, %v1821_v2 }
 0xe00   : > { %v1822_v10 = vsub.f32 %v1805_v62, %v1819_v22  ;;  %v1823_v34 = vsub.f32 %v1806_v61, %v1820_v23  ;;  %v1827_v11 = vsel %vm460_vm0, %v1824_v9, 0.0 }
 0xe01   : > { %1828 = vadd.xlane.f32.xlu0 %v1827_v11 }
 0xe02   : > { %v1825_v12 = vmul.f32 %v1822_v10, %v1822_v10  ;;  %v1826_v36 = vmul.f32 %v1823_v34, %v1823_v34 }
 0xe04   : > { %v1830_v14 = vsel %vm460_vm0, %v1825_v12, 0.0  ;;  %v1833_v28 = vsel %vm1603_vm6, %v1826_v36, 0.0 }
 0xe05   : > { %1831 = vadd.xlane.f32.xlu1 %v1830_v14  ;;  %1834 = vadd.xlane.f32.xlu0 %v1833_v28 }
 0xe8a   : > { %v1829_v16 = vpop.xlane.xlu0 %1828 }
 0xe8b   : > { %v1836_v13 = vmul.f32 0.03125, %v1829_v16 }
 0xe8d   : > { %v1839_v17 = vadd.f32 1e-05, %v1836_v13 }
 0xe8e   : > { %v1835_v19 = vpop.xlane.xlu0 %1834  ;;  %v1832_v20 = vpop.xlane.xlu1 %1831 }
 0xe8f   : > { %2222 = vrsqrt.f32 %v1839_v17  ;;  %v1838_v21 = vmul.f32 0.03125, %v1835_v19  ;;  %v1837_v24 = vmul.f32 0.03125, %v1832_v20 }
 0xe91   : > { %v1841_v25 = vadd.f32 1e-05, %v1838_v21  ;;  %v1840_v26 = vadd.f32 1e-05, %v1837_v24 }
 0xe93   : > { %2224 = vrsqrt.f32 %v1841_v25 }
 0xe94   : > { %2226 = vrsqrt.f32 %v1840_v26 }
 0xe9c   : > { %v2223_v27 = vpop.eup %2222 }
 0xe9d   : > { %v1845_v31 = vmul.f32 %v2223_v27, %v1821_v2 }
 0xe9f   : > { %v1854_v33 = vmul.f32 %v1967_v29, %v1845_v31 }
 0xea0   : > { %v2225_v35 = vpop.eup %2224 }
 0xea1   : > { %v2227_v37 = vpop.eup %2226  ;;  %v1863_v39 = vadd.f32 %v1968_v32, %v1854_v33  ;;  %v1847_v40 = vmul.f32 %v2225_v35, %v1823_v34 }
 0xea2   : > { %v1846_v41 = vmul.f32 %v2227_v37, %v1822_v10 }
 0xea3   : > { %1866 = vst.msk [vmem:[%s440_s29] sm:$0xff] %vm460_vm0, %v1863_v39  ;;  %v1856_v42 = vmul.f32 %v1967_v29, %v1847_v40 }
 0xea4   : > { %v1855_v43 = vmul.f32 %v1967_v29, %v1846_v41 }
 0xea5   : > { %v1865_v44 = vadd.f32 %v1968_v32, %v1856_v42 }
 0xea6   : > { %v1864_v45 = vadd.f32 %v1968_v32, %v1855_v43 }
 0xea7   : > { %1868 = vst.msk [vmem:[%s440_s29 + $0x10] sm:$0x1] %vm1603_vm6, %v1865_v44 }
 0xea8   : > { %1867 = vst.msk [vmem:[%s440_s29 + $0x8] sm:$0xff] %vm460_vm0, %v1864_v45 }
 0xea9 PF: > { %s23_s25 = sadd.s32 1, %s2234_s25  }
 0xeaa   : > { %p20_p4 = scmp.ge.s32.totalorder %s23_s25, 4  }
 0xeac   :  { %22 = sbr.rel (!%p20_p4) target bundleno = 1 (0x1), region = 102 }

</bundles_post_ra>
